<compile_context>
chip_gen: v7x
topology: tpu7x:2x2x1
jax: 0.10.0
libtpu: 0.0.40
codegen_flags: <defaults>
</compile_context>

<pallas_src>
import functools

import jax
import jax.numpy as jnp
import numpy as np
from jax.experimental import pallas as pl
from jax.experimental.pallas import tpu as pltpu


def encoder_layer_kernel(
    x_ref,
    wqkv_ref, bqkv_ref, wo_ref, bo_ref,
    g1_ref, be1_ref,
    w1_ref, b1_ref, w2_ref, b2_ref,
    g2_ref, be2_ref,
    out_ref,
    *, n_heads,
):
    eps = 1e-5
    Bt, L, D = x_ref.shape
    H = n_heads
    dh = D // H
    N = Bt * L
    inv_d = 1.0 / float(D)

    # (Bt, L, D) -> (Bt*L, D): leading-dim merge only (lane dim untouched).
    # Residual / LayerNorm path stays f32; only MXU operands are cast to bf16.
    x = x_ref[...].astype(jnp.float32).reshape(N, D)
    x_b = x.astype(jnp.bfloat16)

    # ---- fused QKV projection: one bf16 MXU matmul, f32 accumulation ---------
    # (1/sqrt(dh) is already folded into the Q columns of wqkv/bqkv host-side.)
    qkv = jnp.dot(x_b, wqkv_ref[...], preferred_element_type=jnp.float32) + bqkv_ref[...]
    q = qkv[:, 0 * D:1 * D].astype(jnp.bfloat16)
    k = qkv[:, 1 * D:2 * D].astype(jnp.bfloat16)
    v = qkv[:, 2 * D:3 * D].astype(jnp.bfloat16)

    def to_heads(t):
        # (N, D) -> (Bt*H, L, dh) using only leading-dim reshapes, static lane
        # slices and a stack along a NEW non-minor axis (all layout-safe).
        t = t.reshape(Bt, L, D)
        t = jnp.stack([t[:, :, h * dh:(h + 1) * dh] for h in range(H)], axis=1)
        return t.reshape(Bt * H, L, dh)

    qh, kh, vh = to_heads(q), to_heads(k), to_heads(v)

    # ---- batched attention over (batch * heads), single softmax body ---------
    s = jnp.einsum("bld,bmd->blm", qh, kh, preferred_element_type=jnp.float32)
    s = s - jnp.max(s, axis=-1, keepdims=True)
    p = jnp.exp(s)
    denom = jnp.sum(p, axis=-1, keepdims=True)
    r = pl.reciprocal(denom, approx=True)
    r = r * (2.0 - denom * r)          # one Newton step -> near-exact 1/denom
    p = (p * r).astype(jnp.bfloat16)
    o = jnp.einsum("blm,bmd->bld", p, vh, preferred_element_type=jnp.float32)

    # Concat heads back on the lane axis, then ONE full-K output projection.
    o = o.reshape(Bt, H, L, dh).astype(jnp.bfloat16)
    o = jnp.concatenate([o[:, h] for h in range(H)], axis=-1).reshape(N, D)
    attn = jnp.dot(o, wo_ref[...], preferred_element_type=jnp.float32) + bo_ref[...]

    def layer_norm(z, g, b):
        # two-pass mean / variance (numerically matches nn.LayerNorm better)
        mu = jnp.sum(z, axis=-1, keepdims=True) * inv_d
        zc = z - mu
        var = jnp.sum(zc * zc, axis=-1, keepdims=True) * inv_d
        return zc * jax.lax.rsqrt(var + eps) * g + b

    # ---- residual + norm1 ----------------------------------------------------
    x1 = layer_norm(x + attn, g1_ref[...], be1_ref[...])

    # ---- position-wise FFN (conv1 -> relu -> conv2, kernel_size=1) -----------
    y = jnp.dot(x1.astype(jnp.bfloat16), w1_ref[...],
                preferred_element_type=jnp.float32) + b1_ref[...]
    y = jnp.maximum(y, 0.0)                          # activation = relu
    y = jnp.dot(y.astype(jnp.bfloat16), w2_ref[...],
                preferred_element_type=jnp.float32) + b2_ref[...]

    # ---- residual + norm2 ------------------------------------------------------
    out = layer_norm(x1 + y, g2_ref[...], be2_ref[...])
    out_ref[...] = out.reshape(Bt, L, D).astype(out_ref.dtype)


def _vmem_capacity_bytes():
    """Physical VMEM of the local TPU; fall back to the v7x floor (64 MiB)."""
    try:
        return int(pltpu.get_tpu_info().vmem_capacity_bytes)
    except Exception:
        return 64 * 1024 * 1024


def _step_bytes(Bt, L, D, F, H):
    """Rough per-grid-step VMEM footprint (activations + pipelined I/O blocks)."""
    N = Bt * L
    io = 2 * 2 * (Bt * L * D * 4)           # x + out blocks, double-buffered, f32
    proj = N * (D + 3 * D) * 4              # x rows (f32) + fused qkv (f32)
    heads = 2 * 3 * N * D * 2               # bf16 q/k/v head-split copies (+slack)
    scores = 2 * Bt * H * L * L * 4         # s and p (f32)
    attn_out = 2 * N * D * 4                # per-head outputs + merged attn
    ffn = N * (F + D) * 4                   # FFN hidden + conv2 output
    return io + proj + heads + scores + attn_out + ffn


def _weight_bytes(D, F):
    w = 2 * (3 * D * D + D * D + D * F + F * D)   # bf16 weights, single-buffered
    b = 4 * (3 * D + D + F + D + 4 * D)           # f32 biases + norm params
    return w + b


def _pick_block_batch(B, L, D, F, H, vmem_budget, target_rows=512):
    """Largest divisor of B whose per-step footprint fits the VMEM budget,
    preferring ~target_rows rows/step and keeping >= 2 grid steps (v7x TCs)."""
    divs = [d for d in range(1, B + 1) if B % d == 0]
    fitting = [d for d in divs if _step_bytes(d, L, D, F, H) <= vmem_budget] or [1]
    preferred = [d for d in fitting if d * L >= target_rows]
    bt = min(preferred) if preferred else max(fitting)
    if bt == B and B > 1:       # keep grid >= 2 so megacore can shard steps
        bt = max(d for d in divs if d < B)
    return bt


def encoder_layer(x, params, *, n_heads, block_batch=None):
    B, L, D = x.shape
    F = params["w1"].shape[1]
    H = n_heads
    assert D % H == 0, "d_model must be divisible by n_heads"

    cap = _vmem_capacity_bytes()
    budget = cap // 2
    Bt = block_batch if block_batch is not None else _pick_block_batch(B, L, D, F, H, budget)
    assert B % Bt == 0, "block_batch must divide batch"

    # Host-side weight fusion (Q|K|V), scale folding, and bf16 casting so the
    # weight DMA is half-size and the kernel feeds the MXU bf16 operands.
    scale = 1.0 / float(np.sqrt(D // H))
    wqkv = jnp.concatenate([params["wq"] * scale, params["wk"], params["wv"]],
                           axis=1).astype(jnp.bfloat16)
    bqkv = jnp.concatenate([params["bq"] * scale, params["bk"], params["bv"]],
                           axis=1).astype(jnp.float32)
    wo = params["wo"].astype(jnp.bfloat16)
    w1 = params["w1"].astype(jnp.bfloat16)
    w2 = params["w2"].astype(jnp.bfloat16)

    need = _step_bytes(Bt, L, D, F, H) + _weight_bytes(D, F)
    vmem_limit = int(min(max(2 * need, 32 * 1024 * 1024), int(cap * 0.85)))

    # Constant-index inputs: fetched once, single-buffered (halves weight VMEM).
    resident = lambda shape: pl.BlockSpec(shape, lambda b: (0, 0),
                                          pipeline_mode=pl.Buffered(1))

    in_specs = [
        pl.BlockSpec((Bt, L, D), lambda b: (b, 0, 0)),  # x  (Bt sequences / step)
        resident((D, 3 * D)), resident((1, 3 * D)),     # fused Wqkv (bf16), bqkv
        resident((D, D)), resident((1, D)),             # Wo (bf16), bo
        resident((1, D)), resident((1, D)),             # norm1 gamma, beta
        resident((D, F)), resident((1, F)),             # conv1 weight (bf16), bias
        resident((F, D)), resident((1, D)),             # conv2 weight (bf16), bias
        resident((1, D)), resident((1, D)),             # norm2 gamma, beta
    ]

    kernel = functools.partial(encoder_layer_kernel, n_heads=H)
    return pl.pallas_call(
        kernel,
        out_shape=jax.ShapeDtypeStruct((B, L, D), x.dtype),
        grid_spec=pltpu.PrefetchScalarGridSpec(
            num_scalar_prefetch=0,
            grid=(B // Bt,),
            in_specs=in_specs,
            out_specs=pl.BlockSpec((Bt, L, D), lambda b: (b, 0, 0)),
        ),
        compiler_params=pltpu.CompilerParams(
            dimension_semantics=("parallel",),
            vmem_limit_bytes=vmem_limit,
        ),
    )(
        x, wqkv, bqkv, wo, params["bo"],
        params["g1"], params["be1"],
        w1, params["b1"], w2, params["b2"],
        params["g2"], params["be2"],
    )


def reference_encoder_layer(x, p, *, n_heads):
    """Pure-JAX f32 reference mirroring the PyTorch forward pass."""
    eps = 1e-5
    B, L, D = x.shape
    dh = D // n_heads
    q = x @ p["wq"] + p["bq"][0]
    k = x @ p["wk"] + p["bk"][0]
    v = x @ p["wv"] + p["bv"][0]
    qh = q.reshape(B, L, n_heads, dh).transpose(0, 2, 1, 3)
    kh = k.reshape(B, L, n_heads, dh).transpose(0, 2, 1, 3)
    vh = v.reshape(B, L, n_heads, dh).transpose(0, 2, 1, 3)
    s = jnp.einsum("bhld,bhmd->bhlm", qh, kh) / np.sqrt(dh)
    a = jax.nn.softmax(s, axis=-1)
    o = jnp.einsum("bhlm,bhmd->bhld", a, vh).transpose(0, 2, 1, 3).reshape(B, L, D)
    new_x = o @ p["wo"] + p["bo"][0]

    def ln(z, g, b):
        mu = jnp.mean(z, axis=-1, keepdims=True)
        var = jnp.mean((z - mu) ** 2, axis=-1, keepdims=True)
        return (z - mu) / jnp.sqrt(var + eps) * g[0] + b[0]

    x1 = ln(x + new_x, p["g1"], p["be1"])
    y = jnp.maximum(x1 @ p["w1"] + p["b1"][0], 0.0)
    y = y @ p["w2"] + p["b2"][0]
    return ln(x1 + y, p["g2"], p["be2"])


def init_params(key, d_model, d_ff):
    ks = jax.random.split(key, 10)
    n = lambda k, shape, s=0.05: (jax.random.normal(k, shape, jnp.float32) * s)
    return {
        "wq": n(ks[0], (d_model, d_model)), "bq": n(ks[1], (1, d_model), 0.01),
        "wk": n(ks[2], (d_model, d_model)), "bk": n(ks[3], (1, d_model), 0.01),
        "wv": n(ks[4], (d_model, d_model)), "bv": n(ks[5], (1, d_model), 0.01),
        "wo": n(ks[6], (d_model, d_model)), "bo": n(ks[7], (1, d_model), 0.01),
        "g1": jnp.ones((1, d_model), jnp.float32),
        "be1": jnp.zeros((1, d_model), jnp.float32),
        # conv1: Conv1d(d_model, d_ff, 1)  -> stored transposed as (d_model, d_ff)
        "w1": n(ks[8], (d_model, d_ff)), "b1": jnp.zeros((1, d_ff), jnp.float32),
        # conv2: Conv1d(d_ff, d_model, 1)  -> stored transposed as (d_ff, d_model)
        "w2": n(ks[9], (d_ff, d_model)), "b2": jnp.zeros((1, d_model), jnp.float32),
        "g2": jnp.ones((1, d_model), jnp.float32),
        "be2": jnp.zeros((1, d_model), jnp.float32),
    }


if __name__ == "__main__":
    B, L, D = 4, 8, 32
    F = 4 * D            # d_ff defaults to 4 * d_model
    H = 4                # heads of the injected attention module

    key = jax.random.PRNGKey(0)
    kx, kp = jax.random.split(key)
    x = jax.random.normal(kx, (B, L, D), jnp.float32)
    params = init_params(kp, D, F)

    out = encoder_layer(x, params, n_heads=H)   # picker -> Bt=2, grid=(2,)
    out = jax.block_until_ready(out)

    ref = reference_encoder_layer(x, params, n_heads=H)
    # bf16 MXU operands (f32 accumulation) -> tolerance loosened vs the f32 ref.
    np.testing.assert_allclose(np.asarray(out), np.asarray(ref), atol=5e-2, rtol=5e-2)

    print("KERNEL_OK")
</pallas_src>

<mosaic_0001>
module attributes {stable_mosaic.version = 11 : i64} {
  func.func @encoder_layer_kernel(%arg0: i32, %arg1: memref<2x8x32xf32, #tpu.memory_space<vmem>>, %arg2: memref<32x96xbf16, #tpu.memory_space<vmem>>, %arg3: memref<1x96xf32, #tpu.memory_space<vmem>>, %arg4: memref<32x32xbf16, #tpu.memory_space<vmem>>, %arg5: memref<1x32xf32, #tpu.memory_space<vmem>>, %arg6: memref<1x32xf32, #tpu.memory_space<vmem>>, %arg7: memref<1x32xf32, #tpu.memory_space<vmem>>, %arg8: memref<32x128xbf16, #tpu.memory_space<vmem>>, %arg9: memref<1x128xf32, #tpu.memory_space<vmem>>, %arg10: memref<128x32xbf16, #tpu.memory_space<vmem>>, %arg11: memref<1x32xf32, #tpu.memory_space<vmem>>, %arg12: memref<1x32xf32, #tpu.memory_space<vmem>>, %arg13: memref<1x32xf32, #tpu.memory_space<vmem>>, %arg14: memref<2x8x32xf32, #tpu.memory_space<vmem>>) attributes {dimension_semantics = [#tpu.dimension_semantics<parallel>], iteration_bounds = array<i64: 2>, scalar_prefetch = 0 : i64, scratch_operands = 0 : i64, tpu.core_type = #tpu.core_type<tc>, window_params = [{transform_indices = @transform_0, window_bounds = array<i64: 2, 8, 32>}, {pipeline_mode = #tpu.pipeline_mode<synchronous>, transform_indices = @transform_1, window_bounds = array<i64: 32, 96>}, {pipeline_mode = #tpu.pipeline_mode<synchronous>, transform_indices = @transform_2, window_bounds = array<i64: 1, 96>}, {pipeline_mode = #tpu.pipeline_mode<synchronous>, transform_indices = @transform_3, window_bounds = array<i64: 32, 32>}, {pipeline_mode = #tpu.pipeline_mode<synchronous>, transform_indices = @transform_4, window_bounds = array<i64: 1, 32>}, {pipeline_mode = #tpu.pipeline_mode<synchronous>, transform_indices = @transform_5, window_bounds = array<i64: 1, 32>}, {pipeline_mode = #tpu.pipeline_mode<synchronous>, transform_indices = @transform_6, window_bounds = array<i64: 1, 32>}, {pipeline_mode = #tpu.pipeline_mode<synchronous>, transform_indices = @transform_7, window_bounds = array<i64: 32, 128>}, {pipeline_mode = #tpu.pipeline_mode<synchronous>, transform_indices = @transform_8, window_bounds = array<i64: 1, 128>}, {pipeline_mode = #tpu.pipeline_mode<synchronous>, transform_indices = @transform_9, window_bounds = array<i64: 128, 32>}, {pipeline_mode = #tpu.pipeline_mode<synchronous>, transform_indices = @transform_10, window_bounds = array<i64: 1, 32>}, {pipeline_mode = #tpu.pipeline_mode<synchronous>, transform_indices = @transform_11, window_bounds = array<i64: 1, 32>}, {pipeline_mode = #tpu.pipeline_mode<synchronous>, transform_indices = @transform_12, window_bounds = array<i64: 1, 32>}, {transform_indices = @transform_13, window_bounds = array<i64: 2, 8, 32>}]} {
    %c0 = arith.constant 0 : index
    %c0_0 = arith.constant 0 : index
    %c0_1 = arith.constant 0 : index
    %0 = vector.load %arg1[%c0, %c0_0, %c0_1] : memref<2x8x32xf32, #tpu.memory_space<vmem>>, vector<2x8x32xf32>
    %1 = vector.shape_cast %0 : vector<2x8x32xf32> to vector<16x32xf32>
    %2 = arith.truncf %1 : vector<16x32xf32> to vector<16x32xbf16>
    %c0_2 = arith.constant 0 : index
    %c0_3 = arith.constant 0 : index
    %3 = vector.load %arg2[%c0_2, %c0_3] : memref<32x96xbf16, #tpu.memory_space<vmem>>, vector<32x96xbf16>
    %cst = arith.constant dense<0.000000e+00> : vector<16x96xf32>
    %4 = tpu.matmul %2, %3, %cst {dimension_numbers = #tpu.dot_dimension_numbers<[1], [0], [0], [1], [0, 0, 1, 1], [], []>} : vector<16x32xbf16>, vector<32x96xbf16>, vector<16x96xf32> -> vector<16x96xf32>
    %c0_4 = arith.constant 0 : index
    %c0_5 = arith.constant 0 : index
    %5 = vector.load %arg3[%c0_4, %c0_5] : memref<1x96xf32, #tpu.memory_space<vmem>>, vector<1x96xf32>
    %6 = vector.broadcast %5 : vector<1x96xf32> to vector<16x96xf32>
    %7 = arith.addf %4, %6 : vector<16x96xf32>
    %8 = vector.extract_strided_slice %7 {offsets = [0, 0], sizes = [16, 32], strides = [1, 1]} : vector<16x96xf32> to vector<16x32xf32>
    %9 = arith.truncf %8 : vector<16x32xf32> to vector<16x32xbf16>
    %10 = vector.extract_strided_slice %7 {offsets = [0, 32], sizes = [16, 32], strides = [1, 1]} : vector<16x96xf32> to vector<16x32xf32>
    %11 = arith.truncf %10 : vector<16x32xf32> to vector<16x32xbf16>
    %12 = vector.extract_strided_slice %7 {offsets = [0, 64], sizes = [16, 32], strides = [1, 1]} : vector<16x96xf32> to vector<16x32xf32>
    %13 = arith.truncf %12 : vector<16x32xf32> to vector<16x32xbf16>
    %14 = vector.shape_cast %9 : vector<16x32xbf16> to vector<2x8x32xbf16>
    %15 = vector.extract_strided_slice %14 {offsets = [0, 0, 0], sizes = [2, 8, 8], strides = [1, 1, 1]} : vector<2x8x32xbf16> to vector<2x8x8xbf16>
    %16 = vector.extract_strided_slice %14 {offsets = [0, 0, 8], sizes = [2, 8, 8], strides = [1, 1, 1]} : vector<2x8x32xbf16> to vector<2x8x8xbf16>
    %17 = vector.extract_strided_slice %14 {offsets = [0, 0, 16], sizes = [2, 8, 8], strides = [1, 1, 1]} : vector<2x8x32xbf16> to vector<2x8x8xbf16>
    %18 = vector.extract_strided_slice %14 {offsets = [0, 0, 24], sizes = [2, 8, 8], strides = [1, 1, 1]} : vector<2x8x32xbf16> to vector<2x8x8xbf16>
    %19 = vector.shape_cast %15 : vector<2x8x8xbf16> to vector<2x1x8x8xbf16>
    %20 = vector.shape_cast %16 : vector<2x8x8xbf16> to vector<2x1x8x8xbf16>
    %21 = vector.shape_cast %17 : vector<2x8x8xbf16> to vector<2x1x8x8xbf16>
    %22 = vector.shape_cast %18 : vector<2x8x8xbf16> to vector<2x1x8x8xbf16>
    %23 = tpu.concatenate %19, %20, %21, %22 in 1 : vector<2x1x8x8xbf16>, vector<2x1x8x8xbf16>, vector<2x1x8x8xbf16>, vector<2x1x8x8xbf16> -> vector<2x4x8x8xbf16>
    %24 = vector.shape_cast %23 : vector<2x4x8x8xbf16> to vector<8x8x8xbf16>
    %25 = vector.shape_cast %11 : vector<16x32xbf16> to vector<2x8x32xbf16>
    %26 = vector.extract_strided_slice %25 {offsets = [0, 0, 0], sizes = [2, 8, 8], strides = [1, 1, 1]} : vector<2x8x32xbf16> to vector<2x8x8xbf16>
    %27 = vector.extract_strided_slice %25 {offsets = [0, 0, 8], sizes = [2, 8, 8], strides = [1, 1, 1]} : vector<2x8x32xbf16> to vector<2x8x8xbf16>
    %28 = vector.extract_strided_slice %25 {offsets = [0, 0, 16], sizes = [2, 8, 8], strides = [1, 1, 1]} : vector<2x8x32xbf16> to vector<2x8x8xbf16>
    %29 = vector.extract_strided_slice %25 {offsets = [0, 0, 24], sizes = [2, 8, 8], strides = [1, 1, 1]} : vector<2x8x32xbf16> to vector<2x8x8xbf16>
    %30 = vector.shape_cast %26 : vector<2x8x8xbf16> to vector<2x1x8x8xbf16>
    %31 = vector.shape_cast %27 : vector<2x8x8xbf16> to vector<2x1x8x8xbf16>
    %32 = vector.shape_cast %28 : vector<2x8x8xbf16> to vector<2x1x8x8xbf16>
    %33 = vector.shape_cast %29 : vector<2x8x8xbf16> to vector<2x1x8x8xbf16>
    %34 = tpu.concatenate %30, %31, %32, %33 in 1 : vector<2x1x8x8xbf16>, vector<2x1x8x8xbf16>, vector<2x1x8x8xbf16>, vector<2x1x8x8xbf16> -> vector<2x4x8x8xbf16>
    %35 = vector.shape_cast %34 : vector<2x4x8x8xbf16> to vector<8x8x8xbf16>
    %36 = vector.shape_cast %13 : vector<16x32xbf16> to vector<2x8x32xbf16>
    %37 = vector.extract_strided_slice %36 {offsets = [0, 0, 0], sizes = [2, 8, 8], strides = [1, 1, 1]} : vector<2x8x32xbf16> to vector<2x8x8xbf16>
    %38 = vector.extract_strided_slice %36 {offsets = [0, 0, 8], sizes = [2, 8, 8], strides = [1, 1, 1]} : vector<2x8x32xbf16> to vector<2x8x8xbf16>
    %39 = vector.extract_strided_slice %36 {offsets = [0, 0, 16], sizes = [2, 8, 8], strides = [1, 1, 1]} : vector<2x8x32xbf16> to vector<2x8x8xbf16>
    %40 = vector.extract_strided_slice %36 {offsets = [0, 0, 24], sizes = [2, 8, 8], strides = [1, 1, 1]} : vector<2x8x32xbf16> to vector<2x8x8xbf16>
    %41 = vector.shape_cast %37 : vector<2x8x8xbf16> to vector<2x1x8x8xbf16>
    %42 = vector.shape_cast %38 : vector<2x8x8xbf16> to vector<2x1x8x8xbf16>
    %43 = vector.shape_cast %39 : vector<2x8x8xbf16> to vector<2x1x8x8xbf16>
    %44 = vector.shape_cast %40 : vector<2x8x8xbf16> to vector<2x1x8x8xbf16>
    %45 = tpu.concatenate %41, %42, %43, %44 in 1 : vector<2x1x8x8xbf16>, vector<2x1x8x8xbf16>, vector<2x1x8x8xbf16>, vector<2x1x8x8xbf16> -> vector<2x4x8x8xbf16>
    %46 = vector.shape_cast %45 : vector<2x4x8x8xbf16> to vector<8x8x8xbf16>
    "tpu.trace_start"() <{level = 10 : i32, message = "bld,bmd->blm"}> : () -> ()
    %cst_6 = arith.constant dense<0.000000e+00> : vector<8x8x8xf32>
    %47 = tpu.matmul %24, %35, %cst_6 {dimension_numbers = #tpu.dot_dimension_numbers<[2], [2], [1], [1], [0, 0, 0, 1, 1, 1], [0], [0]>} : vector<8x8x8xbf16>, vector<8x8x8xbf16>, vector<8x8x8xf32> -> vector<8x8x8xf32>
    "tpu.trace_stop"() : () -> ()
    %cst_7 = arith.constant dense<0xFF800000> : vector<8x8xf32>
    %48 = vector.multi_reduction <maximumf>, %47, %cst_7 [2] : vector<8x8x8xf32> to vector<8x8xf32>
    %49 = vector.shape_cast %48 : vector<8x8xf32> to vector<8x8x1xf32>
    %50 = vector.broadcast %49 : vector<8x8x1xf32> to vector<8x8x8xf32>
    %51 = arith.subf %47, %50 : vector<8x8x8xf32>
    %52 = math.exp %51 : vector<8x8x8xf32>
    %cst_8 = arith.constant dense<0.000000e+00> : vector<8x8xf32>
    %53 = vector.multi_reduction <add>, %52, %cst_8 [2] : vector<8x8x8xf32> to vector<8x8xf32>
    %54 = vector.shape_cast %53 : vector<8x8xf32> to vector<8x8x1xf32>
    %55 = tpu.reciprocal %54 {approx = true} : vector<8x8x1xf32> -> vector<8x8x1xf32>
    %56 = arith.mulf %54, %55 : vector<8x8x1xf32>
    %cst_9 = arith.constant 2.000000e+00 : f32
    %57 = vector.broadcast %cst_9 : f32 to vector<8x8x1xf32>
    %58 = arith.subf %57, %56 : vector<8x8x1xf32>
    %59 = arith.mulf %55, %58 : vector<8x8x1xf32>
    %60 = vector.broadcast %59 : vector<8x8x1xf32> to vector<8x8x8xf32>
    %61 = arith.mulf %52, %60 : vector<8x8x8xf32>
    %62 = arith.truncf %61 : vector<8x8x8xf32> to vector<8x8x8xbf16>
    "tpu.trace_start"() <{level = 10 : i32, message = "blm,bmd->bld"}> : () -> ()
    %cst_10 = arith.constant dense<0.000000e+00> : vector<8x8x8xf32>
    %63 = tpu.matmul %62, %46, %cst_10 {dimension_numbers = #tpu.dot_dimension_numbers<[2], [1], [1], [2], [0, 0, 0, 1, 1, 2], [0], [0]>} : vector<8x8x8xbf16>, vector<8x8x8xbf16>, vector<8x8x8xf32> -> vector<8x8x8xf32>
    "tpu.trace_stop"() : () -> ()
    %64 = vector.shape_cast %63 : vector<8x8x8xf32> to vector<2x4x8x8xf32>
    %65 = arith.truncf %64 : vector<2x4x8x8xf32> to vector<2x4x8x8xbf16>
    %66 = vector.extract_strided_slice %65 {offsets = [0, 0, 0, 0], sizes = [2, 1, 8, 8], strides = [1, 1, 1, 1]} : vector<2x4x8x8xbf16> to vector<2x1x8x8xbf16>
    %67 = vector.shape_cast %66 : vector<2x1x8x8xbf16> to vector<2x8x8xbf16>
    %68 = vector.extract_strided_slice %65 {offsets = [0, 1, 0, 0], sizes = [2, 1, 8, 8], strides = [1, 1, 1, 1]} : vector<2x4x8x8xbf16> to vector<2x1x8x8xbf16>
    %69 = vector.shape_cast %68 : vector<2x1x8x8xbf16> to vector<2x8x8xbf16>
    %70 = vector.extract_strided_slice %65 {offsets = [0, 2, 0, 0], sizes = [2, 1, 8, 8], strides = [1, 1, 1, 1]} : vector<2x4x8x8xbf16> to vector<2x1x8x8xbf16>
    %71 = vector.shape_cast %70 : vector<2x1x8x8xbf16> to vector<2x8x8xbf16>
    %72 = vector.extract_strided_slice %65 {offsets = [0, 3, 0, 0], sizes = [2, 1, 8, 8], strides = [1, 1, 1, 1]} : vector<2x4x8x8xbf16> to vector<2x1x8x8xbf16>
    %73 = vector.shape_cast %72 : vector<2x1x8x8xbf16> to vector<2x8x8xbf16>
    %74 = tpu.concatenate %67, %69, %71, %73 in 2 : vector<2x8x8xbf16>, vector<2x8x8xbf16>, vector<2x8x8xbf16>, vector<2x8x8xbf16> -> vector<2x8x32xbf16>
    %75 = vector.shape_cast %74 : vector<2x8x32xbf16> to vector<16x32xbf16>
    %c0_11 = arith.constant 0 : index
    %c0_12 = arith.constant 0 : index
    %76 = vector.load %arg4[%c0_11, %c0_12] : memref<32x32xbf16, #tpu.memory_space<vmem>>, vector<32x32xbf16>
    %cst_13 = arith.constant dense<0.000000e+00> : vector<16x32xf32>
    %77 = tpu.matmul %75, %76, %cst_13 {dimension_numbers = #tpu.dot_dimension_numbers<[1], [0], [0], [1], [0, 0, 1, 1], [], []>} : vector<16x32xbf16>, vector<32x32xbf16>, vector<16x32xf32> -> vector<16x32xf32>
    %c0_14 = arith.constant 0 : index
    %c0_15 = arith.constant 0 : index
    %78 = vector.load %arg5[%c0_14, %c0_15] : memref<1x32xf32, #tpu.memory_space<vmem>>, vector<1x32xf32>
    %79 = vector.broadcast %78 : vector<1x32xf32> to vector<16x32xf32>
    %80 = arith.addf %77, %79 : vector<16x32xf32>
    %81 = arith.addf %1, %80 : vector<16x32xf32>
    %c0_16 = arith.constant 0 : index
    %c0_17 = arith.constant 0 : index
    %82 = vector.load %arg6[%c0_16, %c0_17] : memref<1x32xf32, #tpu.memory_space<vmem>>, vector<1x32xf32>
    %c0_18 = arith.constant 0 : index
    %c0_19 = arith.constant 0 : index
    %83 = vector.load %arg7[%c0_18, %c0_19] : memref<1x32xf32, #tpu.memory_space<vmem>>, vector<1x32xf32>
    %cst_20 = arith.constant dense<0.000000e+00> : vector<16xf32>
    %84 = vector.multi_reduction <add>, %81, %cst_20 [1] : vector<16x32xf32> to vector<16xf32>
    %85 = vector.shape_cast %84 : vector<16xf32> to vector<16x1xf32>
    %cst_21 = arith.constant 3.125000e-02 : f32
    %86 = vector.broadcast %cst_21 : f32 to vector<16x1xf32>
    %87 = arith.mulf %85, %86 : vector<16x1xf32>
    %88 = vector.broadcast %87 : vector<16x1xf32> to vector<16x32xf32>
    %89 = arith.subf %81, %88 : vector<16x32xf32>
    %90 = arith.mulf %89, %89 : vector<16x32xf32>
    %cst_22 = arith.constant dense<0.000000e+00> : vector<16xf32>
    %91 = vector.multi_reduction <add>, %90, %cst_22 [1] : vector<16x32xf32> to vector<16xf32>
    %92 = vector.shape_cast %91 : vector<16xf32> to vector<16x1xf32>
    %cst_23 = arith.constant 3.125000e-02 : f32
    %93 = vector.broadcast %cst_23 : f32 to vector<16x1xf32>
    %94 = arith.mulf %92, %93 : vector<16x1xf32>
    %cst_24 = arith.constant 9.99999974E-6 : f32
    %95 = vector.broadcast %cst_24 : f32 to vector<16x1xf32>
    %96 = arith.addf %94, %95 : vector<16x1xf32>
    %97 = math.rsqrt %96 : vector<16x1xf32>
    %98 = vector.broadcast %97 : vector<16x1xf32> to vector<16x32xf32>
    %99 = arith.mulf %89, %98 : vector<16x32xf32>
    %100 = vector.broadcast %82 : vector<1x32xf32> to vector<16x32xf32>
    %101 = arith.mulf %99, %100 : vector<16x32xf32>
    %102 = vector.broadcast %83 : vector<1x32xf32> to vector<16x32xf32>
    %103 = arith.addf %101, %102 : vector<16x32xf32>
    %104 = arith.truncf %103 : vector<16x32xf32> to vector<16x32xbf16>
    %c0_25 = arith.constant 0 : index
    %c0_26 = arith.constant 0 : index
    %105 = vector.load %arg8[%c0_25, %c0_26] : memref<32x128xbf16, #tpu.memory_space<vmem>>, vector<32x128xbf16>
    %cst_27 = arith.constant dense<0.000000e+00> : vector<16x128xf32>
    %106 = tpu.matmul %104, %105, %cst_27 {dimension_numbers = #tpu.dot_dimension_numbers<[1], [0], [0], [1], [0, 0, 1, 1], [], []>} : vector<16x32xbf16>, vector<32x128xbf16>, vector<16x128xf32> -> vector<16x128xf32>
    %c0_28 = arith.constant 0 : index
    %c0_29 = arith.constant 0 : index
    %107 = vector.load %arg9[%c0_28, %c0_29] : memref<1x128xf32, #tpu.memory_space<vmem>>, vector<1x128xf32>
    %108 = vector.broadcast %107 : vector<1x128xf32> to vector<16x128xf32>
    %109 = arith.addf %106, %108 : vector<16x128xf32>
    %cst_30 = arith.constant 0.000000e+00 : f32
    %110 = vector.broadcast %cst_30 : f32 to vector<16x128xf32>
    %111 = arith.maximumf %109, %110 : vector<16x128xf32>
    %112 = arith.truncf %111 : vector<16x128xf32> to vector<16x128xbf16>
    %c0_31 = arith.constant 0 : index
    %c0_32 = arith.constant 0 : index
    %113 = vector.load %arg10[%c0_31, %c0_32] : memref<128x32xbf16, #tpu.memory_space<vmem>>, vector<128x32xbf16>
    %cst_33 = arith.constant dense<0.000000e+00> : vector<16x32xf32>
    %114 = tpu.matmul %112, %113, %cst_33 {dimension_numbers = #tpu.dot_dimension_numbers<[1], [0], [0], [1], [0, 0, 1, 1], [], []>} : vector<16x128xbf16>, vector<128x32xbf16>, vector<16x32xf32> -> vector<16x32xf32>
    %c0_34 = arith.constant 0 : index
    %c0_35 = arith.constant 0 : index
    %115 = vector.load %arg11[%c0_34, %c0_35] : memref<1x32xf32, #tpu.memory_space<vmem>>, vector<1x32xf32>
    %116 = vector.broadcast %115 : vector<1x32xf32> to vector<16x32xf32>
    %117 = arith.addf %114, %116 : vector<16x32xf32>
    %118 = arith.addf %103, %117 : vector<16x32xf32>
    %c0_36 = arith.constant 0 : index
    %c0_37 = arith.constant 0 : index
    %119 = vector.load %arg12[%c0_36, %c0_37] : memref<1x32xf32, #tpu.memory_space<vmem>>, vector<1x32xf32>
    %c0_38 = arith.constant 0 : index
    %c0_39 = arith.constant 0 : index
    %120 = vector.load %arg13[%c0_38, %c0_39] : memref<1x32xf32, #tpu.memory_space<vmem>>, vector<1x32xf32>
    %cst_40 = arith.constant dense<0.000000e+00> : vector<16xf32>
    %121 = vector.multi_reduction <add>, %118, %cst_40 [1] : vector<16x32xf32> to vector<16xf32>
    %122 = vector.shape_cast %121 : vector<16xf32> to vector<16x1xf32>
    %cst_41 = arith.constant 3.125000e-02 : f32
    %123 = vector.broadcast %cst_41 : f32 to vector<16x1xf32>
    %124 = arith.mulf %122, %123 : vector<16x1xf32>
    %125 = vector.broadcast %124 : vector<16x1xf32> to vector<16x32xf32>
    %126 = arith.subf %118, %125 : vector<16x32xf32>
    %127 = arith.mulf %126, %126 : vector<16x32xf32>
    %cst_42 = arith.constant dense<0.000000e+00> : vector<16xf32>
    %128 = vector.multi_reduction <add>, %127, %cst_42 [1] : vector<16x32xf32> to vector<16xf32>
    %129 = vector.shape_cast %128 : vector<16xf32> to vector<16x1xf32>
    %cst_43 = arith.constant 3.125000e-02 : f32
    %130 = vector.broadcast %cst_43 : f32 to vector<16x1xf32>
    %131 = arith.mulf %129, %130 : vector<16x1xf32>
    %cst_44 = arith.constant 9.99999974E-6 : f32
    %132 = vector.broadcast %cst_44 : f32 to vector<16x1xf32>
    %133 = arith.addf %131, %132 : vector<16x1xf32>
    %134 = math.rsqrt %133 : vector<16x1xf32>
    %135 = vector.broadcast %134 : vector<16x1xf32> to vector<16x32xf32>
    %136 = arith.mulf %126, %135 : vector<16x32xf32>
    %137 = vector.broadcast %119 : vector<1x32xf32> to vector<16x32xf32>
    %138 = arith.mulf %136, %137 : vector<16x32xf32>
    %139 = vector.broadcast %120 : vector<1x32xf32> to vector<16x32xf32>
    %140 = arith.addf %138, %139 : vector<16x32xf32>
    %141 = vector.shape_cast %140 : vector<16x32xf32> to vector<2x8x32xf32>
    %c0_45 = arith.constant 0 : index
    %c0_46 = arith.constant 0 : index
    %c0_47 = arith.constant 0 : index
    %142 = vector.load %arg14[%c0_45, %c0_46, %c0_47] : memref<2x8x32xf32, #tpu.memory_space<vmem>>, vector<2x8x32xf32>
    tpu.vector_store %arg14[%c0_45, %c0_46, %c0_47], %141 {strides = array<i32>} : memref<2x8x32xf32, #tpu.memory_space<vmem>>, vector<2x8x32xf32>,
    return
  }
  func.func @transform_0(%arg0: i32) -> (i32, i32, i32) {
    %c0_i32 = arith.constant 0 : i32
    %c0_i32_0 = arith.constant 0 : i32
    %c0_i32_1 = arith.constant 0 : i32
    return %arg0, %c0_i32, %c0_i32_0 : i32, i32, i32
  }
  func.func @transform_1(%arg0: i32) -> (i32, i32) {
    %c0_i32 = arith.constant 0 : i32
    %c0_i32_0 = arith.constant 0 : i32
    %c0_i32_1 = arith.constant 0 : i32
    return %c0_i32, %c0_i32_0 : i32, i32
  }
  func.func @transform_2(%arg0: i32) -> (i32, i32) {
    %c0_i32 = arith.constant 0 : i32
    %c0_i32_0 = arith.constant 0 : i32
    %c0_i32_1 = arith.constant 0 : i32
    return %c0_i32, %c0_i32_0 : i32, i32
  }
  func.func @transform_3(%arg0: i32) -> (i32, i32) {
    %c0_i32 = arith.constant 0 : i32
    %c0_i32_0 = arith.constant 0 : i32
    %c0_i32_1 = arith.constant 0 : i32
    return %c0_i32, %c0_i32_0 : i32, i32
  }
  func.func @transform_4(%arg0: i32) -> (i32, i32) {
    %c0_i32 = arith.constant 0 : i32
    %c0_i32_0 = arith.constant 0 : i32
    %c0_i32_1 = arith.constant 0 : i32
    return %c0_i32, %c0_i32_0 : i32, i32
  }
  func.func @transform_5(%arg0: i32) -> (i32, i32) {
    %c0_i32 = arith.constant 0 : i32
    %c0_i32_0 = arith.constant 0 : i32
    %c0_i32_1 = arith.constant 0 : i32
    return %c0_i32, %c0_i32_0 : i32, i32
  }
  func.func @transform_6(%arg0: i32) -> (i32, i32) {
    %c0_i32 = arith.constant 0 : i32
    %c0_i32_0 = arith.constant 0 : i32
    %c0_i32_1 = arith.constant 0 : i32
    return %c0_i32, %c0_i32_0 : i32, i32
  }
  func.func @transform_7(%arg0: i32) -> (i32, i32) {
    %c0_i32 = arith.constant 0 : i32
    %c0_i32_0 = arith.constant 0 : i32
    %c0_i32_1 = arith.constant 0 : i32
    return %c0_i32, %c0_i32_0 : i32, i32
  }
  func.func @transform_8(%arg0: i32) -> (i32, i32) {
    %c0_i32 = arith.constant 0 : i32
    %c0_i32_0 = arith.constant 0 : i32
    %c0_i32_1 = arith.constant 0 : i32
    return %c0_i32, %c0_i32_0 : i32, i32
  }
  func.func @transform_9(%arg0: i32) -> (i32, i32) {
    %c0_i32 = arith.constant 0 : i32
    %c0_i32_0 = arith.constant 0 : i32
    %c0_i32_1 = arith.constant 0 : i32
    return %c0_i32, %c0_i32_0 : i32, i32
  }
  func.func @transform_10(%arg0: i32) -> (i32, i32) {
    %c0_i32 = arith.constant 0 : i32
    %c0_i32_0 = arith.constant 0 : i32
    %c0_i32_1 = arith.constant 0 : i32
    return %c0_i32, %c0_i32_0 : i32, i32
  }
  func.func @transform_11(%arg0: i32) -> (i32, i32) {
    %c0_i32 = arith.constant 0 : i32
    %c0_i32_0 = arith.constant 0 : i32
    %c0_i32_1 = arith.constant 0 : i32
    return %c0_i32, %c0_i32_0 : i32, i32
  }
  func.func @transform_12(%arg0: i32) -> (i32, i32) {
    %c0_i32 = arith.constant 0 : i32
    %c0_i32_0 = arith.constant 0 : i32
    %c0_i32_1 = arith.constant 0 : i32
    return %c0_i32, %c0_i32_0 : i32, i32
  }
  func.func @transform_13(%arg0: i32) -> (i32, i32, i32) {
    %c0_i32 = arith.constant 0 : i32
    %c0_i32_0 = arith.constant 0 : i32
    %c0_i32_1 = arith.constant 0 : i32
    return %arg0, %c0_i32, %c0_i32_0 : i32, i32, i32
  }
}

</mosaic_0001>

<bundles_post_ra>
// kernel: tpu_custom_call.1
= control target key start
LH: loop header
LB: loop body
LE: loop exit
PB: predicated region body
PF: predicated region fallthrough
CT: control target
= control target key end

     0   :  { %s2802_s0 = inlined_call_operand.vmem [shape: f32[4,8,32], index: 0, kind: input, shape index: {}]   ;;  %s2803_s1 = inlined_call_operand.vmem [shape: bf16[32,96], index: 1, kind: input, shape index: {}]   ;;  %s2804_s2 = inlined_call_operand.vmem [shape: f32[1,96], index: 2, kind: input, shape index: {}]   ;;  %s2805_s3 = inlined_call_operand.vmem [shape: bf16[32,32], index: 3, kind: input, shape index: {}]   ;;  %s2806_s4 = inlined_call_operand.vmem [shape: f32[1,32], index: 4, kind: input, shape index: {}]   ;;  %s2807_s5 = inlined_call_operand.vmem [shape: f32[1,32], index: 5, kind: input, shape index: {}]   ;;  %s2808_s6 = inlined_call_operand.vmem [shape: f32[1,32], index: 6, kind: input, shape index: {}]   ;;  %s2809_s7 = inlined_call_operand.vmem [shape: bf16[32,128], index: 7, kind: input, shape index: {}]   ;;  %s2810_s8 = inlined_call_operand.vmem [shape: f32[1,128], index: 8, kind: input, shape index: {}]   ;;  %s2811_s9 = inlined_call_operand.vmem [shape: bf16[128,32], index: 9, kind: input, shape index: {}]   ;;  %s2812_s10 = inlined_call_operand.vmem [shape: f32[1,32], index: 10, kind: input, shape index: {}]   ;;  %s2813_s11 = inlined_call_operand.vmem [shape: f32[1,32], index: 11, kind: input, shape index: {}]   ;;  %s2814_s12 = inlined_call_operand.vmem [shape: f32[1,32], index: 12, kind: input, shape index: {}]   ;;  %s2815_s13 = inlined_call_operand.hbm [shape: f32[4,8,32], index: 13, kind: output, shape index: {}]  }
   0x1   :  { %2817 = sst [smem:[#allocation5_spill]] %s2802_s0 }
   0x2   :  { %2818 = sst [smem:[#allocation6_spill]] %s2803_s1 }
   0x3   :  { %2819 = sst [smem:[#allocation7_spill]] %s2804_s2 }
   0x4   :  { %2820 = sst [smem:[#allocation8_spill]] %s2805_s3 }
   0x5   :  { %18 = vsyncpa [#allocation3], 0 }
   0x6   :  { %20 = vsyncpa [#allocation3 + $0x1], 0  ;;  %s2406_s25 = smov 0   ;;  %s2408_s26 = smov 0  }
   0x7   :  { %s2410_s27 = smov 0   ;;  %s2412_s28 = smov 0  }
   0x8 LB: > { %s2427_s29 = sadd.s32 4294967295, %s2322_s28   ;;  %s1901_s30 = sadd.s32 4294967294, %s2322_s28   ;;  %s2322_s28 = sphi %s2412_s28, %s2831_s28   ;;  %s2318_s27 = sphi %s2410_s27, %s2830_s27   ;;  %s2314_s26 = sphi %s2408_s26, %s2829_s26   ;;  %s2310_s25 = sphi %s2406_s25, %s2828_s25  }
   0x9   : > { %s2431_s14 = sadd.s32 1, %s2322_s28   ;;  %s311_s15 = sadd.s32 1, %s2318_s27 }
   0xa   : > { %s308_s16 = ssub.s32 %s2322_s28, %s2431_s14  ;;  %p321_p0 = scmp.ne.s32.totalorder %s2318_s27, %s2314_s26 }
   0xb   : > { %p309_p1 = scmp.eq.s32.totalorder %s308_s16, 0  ;;  %p322_p2 = scmp.eq.s32.totalorder %s2427_s29, 1 }
   0xc   : > { %p327_p3 = scmp.ne.s32.totalorder %s2314_s26, %s2310_s25  ;;  %p328_p4 = scmp.eq.s32.totalorder %s1901_s30, 1 }
   0xd   : > { %s2442_s17 = scalar_select %p309_p1, %s2318_s27, %s311_s15  }
   0xe   : > { %p2444_p5 = por %p322_p2, %p321_p0  ;;  %p2448_p6 = por %p328_p4, %p327_p3 }
   0xf   : > { %p1904_p7 = scmp.ge.s32.totalorder %s2322_s28, 1  ;;  %p391_p8 = scmp.lt.s32.totalorder %s2322_s28, 3 }
  0x11   : > { %p392_p9 = pnand %p1904_p7, %p391_p8 }
  0x12   : > { %s2823_s1 = sld [smem:[#allocation6_spill]] (!%p392_p9)  ;;  %v2324_v1 = vmov (!%p392_p9), 0.0   ;;  %vm2325_vm0 = vmmov (!%p392_p9), 0   ;;  %s1906_s24 = sshll.u32 (!%p392_p9), %s2427_s29, 1  ;;  %vm469_vm1 = vcmask (!%p392_p9), 261120   ;;  %vm534_vm2 = vcmask (!%p392_p9), 64512  }
  0x13   : > { %395 = sbr.rel (%p392_p9) target bundleno = 2724 (0xaa4), region = 72  ;;  %2016 = vmatprep.subr.bf16.mxu0 (!%p392_p9), %v2324_v1  ;;  %2036 = vmatprep.subr.bf16.mxu1 (!%p392_p9), %v2324_v1  ;;  %p436_p10 = scmp.lt.s32.totalorder (!%p392_p9), %s1906_s24, 3  ;;  %vm1054_vm3 = vcmask (!%p392_p9), 1043456   ;;  %vm1466_vm4 = vcmask (!%p392_p9), 130048   ;;  %vm1471_vm5 = vcmask (!%p392_p9), 195584  }
  0x14   : > { %2020 = vmatprep.mubr.msk.bf16.mxu0 (!%p392_p9), %vm2325_vm0, %v2324_v1  ;;  %2038 = vmatprep.mubr.msk.bf16.mxu1 (!%p392_p9), %vm2325_vm0, %v2324_v1  ;;  %s2824_s0 = sld [smem:[#allocation5_spill]] (!%p392_p9)  ;;  %s2825_s2 = sld [smem:[#allocation7_spill]] (!%p392_p9) }
  0x15   : > { %s2326_s23 = smov (!%p392_p9), 104   ;;  %s2329_s15 = smov (!%p392_p9), 96  }
  0x16   : > { %s2330_s16 = smov (!%p392_p9), 64   ;;  %s2332_s21 = smov (!%p392_p9), 16  }
  0x17   : > { %s2333_s22 = smov (!%p392_p9), 24   ;;  %s2826_s3 = sld [smem:[#allocation8_spill]] (!%p392_p9) }
  0x18   : > { %v2206_v0 = vld [vmem:[%s2823_s1] sm:$0xff] (!%p392_p9)   ;;  %v2207_v2 = vld [vmem:[%s2823_s1 + $0x8] sm:$0xff] (!%p392_p9)   ;;  %s2334_s1 = smov (!%p392_p9), [#allocation2]  }
  0x19   : > { %2017 = vmatpush3.bf16.msra.mxu0 (!%p392_p9), %v2206_v0 }
  0x1a   : > { %2018 = vmatprep.subr.bf16.mxu0 %v2324_v1  ;;  %s2833_s24 = smov (!%p436_p10, %s1906_s24), 3  ;;  %v1908_v6 = vld [vmem:[%s2825_s2] ss:$0 sm:$0xff]  ;;  %s2264_s2 = sshll.u32 %s2334_s1, 4  ;;  %s2265_s2 = int_to_ptr.vmem [resolvable:$false] %s2264_s2 }
  0x1b   : > { %s1907_s30 = sshll.u32 %s2833_s24, 3  ;;  %s2327_s24 = smov 120  }
  0x1c   : > { %s439_s20 = scalar_lea.vmem %s2824_s0, %s1907_s30  ;;  %s2328_s30 = smov 112  }
  0x1d   : > { %2019 = vmatpush3.bf16.msra.mxu0 %v2207_v2  ;;  %v2472_v3 = vld [vmem:[%s439_s20] sm:$0xff]  ;;  %v2474_v4 = vld [vmem:[%s439_s20 + $0x8] sm:$0xff]  ;;  %s2816_s20 = smov 8  }
  0x1e   : > { %2024 = vmatprep.subr.bf16.mxu0 %v2324_v1  ;;  %v445_v5 = vpack.c.bf16 %v2474_v4, %v2472_v3 }
  0x20   : > { %2021 = vmatmul.mubr.msk.bf16.vlgmr.msra.gmra.mrb[0].mxu0 %vm469_vm1, %v445_v5 }
  0x21   : > { %2026 = vmatprep.mubr.msk.bf16.mxu0 %vm2325_vm0, %v2324_v1 }
  0xf3   : > { %v507_v7 = vpop.f32.mrb[0].mxu0 }
  0xf4   : > { %v508_v8 = vadd.f32 %v1908_v6, %v507_v7  ;;  %v2022_v9 = vpop.f32.mrb[1].mxu0 }
  0xf5   : > { %v510_v10 = vpop.f32.mrb[2].mxu0 }
  0xf6   : > { %v1963_v11 = vpack.c.bf16 %v508_v8, %v508_v8  ;;  %v511_v12 = vadd.f32 %v1908_v6, %v510_v10  ;;  %v2023_v13 = vpop.f32.mrb[3].mxu0 }
  0xf8   : > { %528 = vrot.lane.b32.xlu1 %v1963_v11, %s2326_s23  ;;  %520 = vrot.lane.b32.xlu0 %v1963_v11, %s2327_s24  ;;  %v2484_v14 = vpack.c.bf16 %v511_v12, %v511_v12 }
  0xfc   : > { %524 = vrot.lane.b32.xlu0 %v1963_v11, %s2328_s30  ;;  %522 = vrot.lane.b32.xlu1 %v2484_v14, %s2327_s24  ;;  %s1965_s24 = sshll.u32 %s2427_s29, 8 }
 0x100   : > { %526 = vrot.lane.b32.xlu0 %v2484_v14, %s2328_s30  ;;  %530 = vrot.lane.b32.xlu1 %v2484_v14, %s2326_s23 }
 0x104   : > { %532 = vrot.lane.b32.xlu0 %v1963_v11, %s2329_s15 }
 0x16a   : > { %v529_v15 = vpop.permute.xlu1 %528  ;;  %v521_v16 = vpop.permute.xlu0 %520 }
 0x16b   : > { %v2489_v17 = vcombine.low %v521_v16, %v521_v16  ;;  %v2492_v20 = vcombine.low %v529_v15, %v529_v15 }
 0x16d   : > { %583 = vrot.lane.b32.xlu1 %v2489_v17, %s2329_s15 }
 0x16e   : > { %v525_v18 = vpop.permute.xlu0 %524  ;;  %v523_v19 = vpop.permute.xlu1 %522 }
 0x16f   : > { %v2494_v21 = vcombine.low %v525_v18, %v525_v18  ;;  %v2498_v23 = vcombine.low %v523_v19, %v523_v19 }
 0x171   : > { %633 = vrot.lane.b32.xlu0 %v2494_v21, %s2329_s15  ;;  %683 = vrot.lane.b32.xlu1 %v2492_v20, %s2329_s15 }
 0x172   : > { %v527_v22 = vpop.permute.xlu0 %526  ;;  %v531_v24 = vpop.permute.xlu1 %530 }
 0x173   : > { %v2502_v26 = vcombine.low %v527_v22, %v527_v22  ;;  %v2504_v27 = vcombine.low %v531_v24, %v531_v24 }
 0x175   : > { %731 = vrot.lane.b32.xlu0 %v2484_v14, %s2329_s15  ;;  %781 = vrot.lane.b32.xlu1 %v2498_v23, %s2329_s15 }
 0x176   : > { %v533_v25 = vpop.permute.xlu0 %532 }
 0x177   : > { %v539_v28 = vsel %vm534_vm2, %v533_v25, 0 }
 0x178   : > { %2025 = vmatpush3.bf16.xpose.msra.mxu0 %v539_v28 }
 0x179   : > { %831 = vrot.lane.b32.xlu0 %v2502_v26, %s2329_s15  ;;  %881 = vrot.lane.b32.xlu1 %v2504_v27, %s2329_s15  ;;  %s432_s15 = sand.u32 1, %s2314_s26  }
 0x17a   : > { %2030 = vmatprep.subr.bf16.mxu0 %v2324_v1  ;;  %s2760_s29 = scalar_lea.sflag [#allocation3], %s432_s15 }
 0x17d   : > { %1049 = vrot.lane.b32.xlu1 %v1963_v11, %s2330_s16 }
 0x17f   : > { %2027 = vmatmul.mubr.msk.bf16.vlgmr.msra.gmra.mrb[4].mxu0 %vm534_vm2, %v1963_v11 }
 0x180   : > { %2032 = vmatprep.mubr.msk.bf16.mxu0 %vm2325_vm0, %v2324_v1 }
 0x1df   : > { %v584_v29 = vpop.permute.xlu1 %583 }
 0x1e0   : > { %v589_v30 = vsel %vm534_vm2, %v584_v29, 0 }
 0x1e1   : > { %2031 = vmatpush3.bf16.xpose.msra.mxu0 %v589_v30 }
 0x1e2   : > { %2042 = vmatprep.subr.bf16.mxu0 %v2324_v1 }
 0x1e3   : > { %v634_v31 = vpop.permute.xlu0 %633  ;;  %v684_v33 = vpop.permute.xlu1 %683 }
 0x1e4   : > { %v639_v32 = vsel %vm534_vm2, %v634_v31, 0  ;;  %v689_v34 = vsel %vm534_vm2, %v684_v33, 0 }
 0x1e5   : > { %2037 = vmatpush3.bf16.xpose.msra.mxu1 %v639_v32 }
 0x1e6   : > { %2048 = vmatprep.subr.bf16.mxu1 %v2324_v1 }
 0x1e7   : > { %v732_v35 = vpop.permute.xlu0 %731  ;;  %v782_v37 = vpop.permute.xlu1 %781 }
 0x1e8   : > { %2033 = vmatmul.mubr.msk.bf16.vlgmr.msra.gmra.mrb[8].mxu0 %vm534_vm2, %v521_v16  ;;  %v737_v36 = vsel %vm534_vm2, %v732_v35, 0  ;;  %v787_v38 = vsel %vm534_vm2, %v782_v37, 0 }
 0x1e9   : > { %2043 = vmatpush3.bf16.xpose.msra.mxu0 %v689_v34  ;;  %2044 = vmatprep.mubr.msk.bf16.mxu0 %vm2325_vm0, %v2324_v1 }
 0x1ea   : > { %2054 = vmatprep.subr.bf16.mxu0 %v2324_v1 }
 0x1eb   : > { %v832_v39 = vpop.permute.xlu0 %831  ;;  %v882_v40 = vpop.permute.xlu1 %881 }
 0x1ec   : > { %2039 = vmatmul.mubr.msk.bf16.vlgmr.msra.gmra.mrb[0].mxu1 %vm534_vm2, %v525_v18  ;;  %v837_v41 = vsel %vm534_vm2, %v832_v39, 0  ;;  %v887_v42 = vsel %vm534_vm2, %v882_v40, 0 }
 0x1ed   : > { %2049 = vmatpush3.bf16.xpose.msra.mxu1 %v737_v36  ;;  %2050 = vmatprep.mubr.msk.bf16.mxu1 %vm2325_vm0, %v2324_v1 }
 0x1ee   : > { %2060 = vmatprep.subr.bf16.mxu1 %v2324_v1 }
 0x1ef   : > { %v1050_v43 = vpop.permute.xlu1 %1049 }
 0x1f0   : > { %2045 = vmatmul.mubr.msk.bf16.vlgmr.msra.gmra.mrb[12].mxu0 %vm534_vm2, %v529_v15  ;;  %v1056_v44 = vsel %vm1054_vm3, %v1050_v43, 0 }
 0x1f1   : > { %2055 = vmatpush3.bf16.xpose.msra.mxu0 %v787_v38  ;;  %2056 = vmatprep.mubr.msk.bf16.mxu0 %vm2325_vm0, %v2324_v1 }
 0x1f2   : > { %2066 = vmatprep.subr.bf16.mxu0 %v2324_v1 }
 0x1f4   : > { %2051 = vmatmul.mubr.msk.bf16.vlgmr.msra.gmra.mrb[4].mxu1 %vm534_vm2, %v2484_v14 }
 0x1f5   : > { %2061 = vmatpush3.bf16.xpose.msra.mxu1 %v837_v41  ;;  %2062 = vmatprep.mubr.msk.bf16.mxu1 %vm2325_vm0, %v2324_v1 }
 0x1f6   : > { %2072 = vmatprep.subr.bf16.mxu1 %v2324_v1 }
 0x1f8   : > { %2057 = vmatmul.mubr.msk.bf16.vlgmr.msra.gmra.mrb[16].mxu0 %vm534_vm2, %v523_v19 }
 0x1f9   : > { %2067 = vmatpush3.bf16.xpose.msra.mxu0 %v887_v42  ;;  %2068 = vmatprep.mubr.msk.bf16.mxu0 %vm2325_vm0, %v2324_v1 }
 0x1fa   : > { %2078 = vmatprep.subr.bf16.mxu0 %v2324_v1 }
 0x1fc   : > { %2063 = vmatmul.mubr.msk.bf16.vlgmr.msra.gmra.mrb[8].mxu1 %vm534_vm2, %v527_v22 }
 0x1fd   : > { %2073 = vmatpush3.bf16.msra.mxu1 %v1056_v44  ;;  %2074 = vmatprep.mubr.msk.bf16.mxu1 %vm2325_vm0, %v2324_v1 }
 0x1fe   : > { %2084 = vmatprep.subr.bf16.mxu1 %v2324_v1 }
 0x200   : > { %2069 = vmatmul.mubr.msk.bf16.vlgmr.msra.gmra.mrb[20].mxu0 %vm534_vm2, %v531_v24 }
 0x201   : > { %2080 = vmatprep.mubr.msk.bf16.mxu0 %vm2325_vm0, %v2324_v1 }
 0x252   : > { %v575_v45 = vpop.f32.mrb[4].mxu0 }
 0x253   : > { %v2028_v46 = vpop.f32.mrb[5].mxu0  ;;  %v929_v47 = vsel %vm534_vm2, %v575_v45, -inf }
 0x254   : > { %930 = vmax.xlane.f32.xlu0 %v929_v47  ;;  %v578_v48 = vpop.f32.mrb[6].mxu0 }
 0x255   : > { %v2029_v49 = vpop.f32.mrb[7].mxu0 }
 0x2bb   : > { %v625_v50 = vpop.f32.mrb[8].mxu0 }
 0x2bc   : > { %v2034_v51 = vpop.f32.mrb[9].mxu0  ;;  %v932_v52 = vsel %vm534_vm2, %v625_v50, -inf }
 0x2bd   : > { %933 = vmax.xlane.f32.xlu1 %v932_v52  ;;  %v628_v53 = vpop.f32.mrb[10].mxu0 }
 0x2be   : > { %v2035_v54 = vpop.f32.mrb[11].mxu0 }
 0x2bf   : > { %v675_v55 = vpop.f32.mrb[0].mxu1 }
 0x2c0   : > { %v2040_v56 = vpop.f32.mrb[1].mxu1  ;;  %v935_v57 = vsel %vm534_vm2, %v675_v55, -inf }
 0x2c1   : > { %v678_v58 = vpop.f32.mrb[2].mxu1  ;;  %936 = vmax.xlane.f32.xlu0 %v935_v57 }
 0x2c2   : > { %v2041_v59 = vpop.f32.mrb[3].mxu1 }
 0x2c3   : > { %v725_v60 = vpop.f32.mrb[12].mxu0 }
 0x2c4   : > { %v2046_v61 = vpop.f32.mrb[13].mxu0  ;;  %v938_v62 = vsel %vm534_vm2, %v725_v60, -inf }
 0x2c5   : > { %939 = vmax.xlane.f32.xlu0 %v938_v62  ;;  %v728_v63 = vpop.f32.mrb[14].mxu0 }
 0x2c6   : > { %v2047_v0 = vpop.f32.mrb[15].mxu0 }
 0x2c7   : > { %v773_v2 = vpop.f32.mrb[4].mxu1 }
 0x2c8   : > { %v2052_v5 = vpop.f32.mrb[5].mxu1  ;;  %v941_v6 = vsel %vm534_vm2, %v773_v2, -inf }
 0x2c9   : > { %v776_v7 = vpop.f32.mrb[6].mxu1  ;;  %942 = vmax.xlane.f32.xlu1 %v941_v6 }
 0x2ca   : > { %v2053_v8 = vpop.f32.mrb[7].mxu1 }
 0x2cb   : > { %v823_v9 = vpop.f32.mrb[16].mxu0 }
 0x2cc   : > { %v2058_v10 = vpop.f32.mrb[17].mxu0  ;;  %v944_v11 = vsel %vm534_vm2, %v823_v9, -inf }
 0x2cd   : > { %945 = vmax.xlane.f32.xlu0 %v944_v11  ;;  %v826_v12 = vpop.f32.mrb[18].mxu0 }
 0x2ce   : > { %v2059_v13 = vpop.f32.mrb[19].mxu0 }
 0x2cf   : > { %v2558_v15 = vpop.f32.mrb[8].mxu1 }
 0x2d0   : > { %v2064_v16 = vpop.f32.mrb[9].mxu1  ;;  %v947_v18 = vsel %vm534_vm2, %v2558_v15, -inf }
 0x2d1   : > { %v876_v19 = vpop.f32.mrb[10].mxu1  ;;  %948 = vmax.xlane.f32.xlu1 %v947_v18 }
 0x2d2   : > { %v2065_v22 = vpop.f32.mrb[11].mxu1 }
 0x2d3   : > { %v2562_v24 = vpop.f32.mrb[20].mxu0 }
 0x2d4   : > { %v2070_v25 = vpop.f32.mrb[21].mxu0  ;;  %v950_v28 = vsel %vm534_vm2, %v2562_v24, -inf }
 0x2d5   : > { %951 = vmax.xlane.f32.xlu0 %v950_v28  ;;  %v926_v29 = vpop.f32.mrb[22].mxu0 }
 0x2d6   : > { %v2071_v30 = vpop.f32.mrb[23].mxu0 }
 0x2e1   : > { %v931_v31 = vpop.xlane.xlu0 %930 }
 0x2e2   : > { %1146 = vrot.lane.b32.xlu1 %v2494_v21, %s2330_s16  ;;  %v953_v32 = vsub.f32 %v575_v45, %v931_v31 }
 0x2e4   : > { %v961_v33 = vmul.f32 1.442695, %v953_v32 }
 0x2e6   : > { %1194 = vrot.lane.b32.xlu1 %v2492_v20, %s2330_s16  ;;  %2220 = vpow2.f32 %v961_v33 }
 0x2eb   : > { %1098 = vrot.lane.b32.xlu0 %v2489_v17, %s2330_s16 }
 0x2f0   : > { %v2572_v34 = vpop.eup %2220 }
 0x2f1   : > { %v977_v35 = vsel %vm534_vm2, %v2572_v34, 0.0 }
 0x30a   : > { %978 = vadd.xlane.f32.xlu1 %v977_v35 }
 0x34a   : > { %v934_v36 = vpop.xlane.xlu1 %933 }
 0x34b   : > { %v954_v37 = vsub.f32 %v625_v50, %v934_v36 }
 0x34d   : > { %v963_v38 = vmul.f32 1.442695, %v954_v37 }
 0x34e   : > { %v937_v21 = vpop.xlane.xlu0 %936 }
 0x34f   : > { %2222 = vpow2.f32 %v963_v38  ;;  %v955_v39 = vsub.f32 %v675_v55, %v937_v21 }
 0x351   : > { %v965_v20 = vmul.f32 1.442695, %v955_v39 }
 0x352   : > { %v940_v40 = vpop.xlane.xlu0 %939 }
 0x353   : > { %2224 = vpow2.f32 %v965_v20  ;;  %v956_v17 = vsub.f32 %v725_v60, %v940_v40 }
 0x355   : > { %v967_v41 = vmul.f32 1.442695, %v956_v17 }
 0x356   : > { %v943_v42 = vpop.xlane.xlu1 %942 }
 0x357   : > { %2226 = vpow2.f32 %v967_v41  ;;  %v957_v43 = vsub.f32 %v773_v2, %v943_v42 }
 0x359   : > { %v2576_v44 = vpop.eup %2222  ;;  %v969_v45 = vmul.f32 1.442695, %v957_v43 }
 0x35a   : > { %v946_v46 = vpop.xlane.xlu0 %945  ;;  %v980_v47 = vsel %vm534_vm2, %v2576_v44, 0.0 }
 0x35b   : > { %2228 = vpow2.f32 %v969_v45  ;;  %v958_v48 = vsub.f32 %v823_v9, %v946_v46  ;;  %981 = vadd.xlane.f32.xlu0 %v980_v47 }
 0x35d   : > { %v2580_v49 = vpop.eup %2224  ;;  %v971_v50 = vmul.f32 1.442695, %v958_v48 }
 0x35e   : > { %v983_v51 = vsel %vm534_vm2, %v2580_v49, 0.0  ;;  %v949_v61 = vpop.xlane.xlu1 %948 }
 0x35f   : > { %2230 = vpow2.f32 %v971_v50  ;;  %984 = vadd.xlane.f32.xlu1 %v983_v51  ;;  %v959_v62 = vsub.f32 %v2558_v15, %v949_v61 }
 0x361   : > { %v2584_v52 = vpop.eup %2226  ;;  %v973_v63 = vmul.f32 1.442695, %v959_v62 }
 0x362   : > { %v952_v53 = vpop.xlane.xlu0 %951  ;;  %v986_v54 = vsel %vm534_vm2, %v2584_v52, 0.0  ;;  %v1147_v2 = vpop.permute.xlu1 %1146 }
 0x363   : > { %987 = vadd.xlane.f32.xlu0 %v986_v54  ;;  %v960_v0 = vsub.f32 %v2562_v24, %v952_v53  ;;  %2232 = vpow2.f32 %v973_v63  ;;  %v1152_v18 = vsel %vm1054_vm3, %v1147_v2, 0 }
 0x365   : > { %v2588_v55 = vpop.eup %2228  ;;  %v975_v5 = vmul.f32 1.442695, %v960_v0 }
 0x366   : > { %v1099_v56 = vpop.permute.xlu0 %1098  ;;  %v989_v57 = vsel %vm534_vm2, %v2588_v55, 0.0  ;;  %v1195_v6 = vpop.permute.xlu1 %1194 }
 0x367   : > { %v1104_v58 = vsel %vm1054_vm3, %v1099_v56, 0  ;;  %990 = vadd.xlane.f32.xlu1 %v989_v57  ;;  %2234 = vpow2.f32 %v975_v5  ;;  %v1200_v21 = vsel %vm1054_vm3, %v1195_v6, 0 }
 0x368   : > { %2079 = vmatpush3.bf16.msra.mxu0 %v1104_v58 }
 0x369   : > { %v2593_v59 = vpop.eup %2230  ;;  %2090 = vmatprep.subr.bf16.mxu0 %v2324_v1 }
 0x36a   : > { %v992_v60 = vsel %vm534_vm2, %v2593_v59, 0.0 }
 0x36b   : > { %993 = vadd.xlane.f32.xlu0 %v992_v60 }
 0x36d   : > { %v2604_v8 = vpop.eup %2232 }
 0x371   : > { %v2608_v9 = vpop.eup %2234 }
 0x378   : > { %1290 = vrot.lane.b32.xlu1 %v2498_v23, %s2330_s16  ;;  %v995_v23 = vsel %vm534_vm2, %v2604_v8, 0.0 }
 0x381   : > { %1242 = vrot.lane.b32.xlu0 %v2484_v14, %s2330_s16  ;;  %v998_v14 = vsel %vm534_vm2, %v2608_v9, 0.0 }
 0x397   : > { %v979_v7 = vpop.xlane.xlu1 %978 }
 0x398   : > { %2236 = vrcp.f32 %v979_v7 }
 0x39c   : > { %996 = vadd.xlane.f32.xlu1 %v995_v23 }
 0x3a0   : > { %999 = vadd.xlane.f32.xlu0 %v998_v14 }
 0x3a2   : > { %v2237_v10 = vpop.eup %2236 }
 0x3a3   : > { %v1009_v11 = vmul.f32 %v2237_v10, %v979_v7 }
 0x3a5   : > { %v1017_v12 = vsub.f32 2.0, %v1009_v11 }
 0x3a7   : > { %v1025_v13 = vmul.f32 %v2237_v10, %v1017_v12 }
 0x3a9   : > { %v1033_v15 = vmul.f32 %v2572_v34, %v1025_v13 }
 0x3ab   : > { %v1041_v16 = vpack.c.bf16 %v1033_v15, %v1033_v15 }
 0x3ad   : > { %1386 = vrot.lane.b32.xlu1 %v2504_v27, %s2330_s16  ;;  %2075 = vmatmul.mubr.msk.bf16.vlgmr.msra.gmra.mrb[12].mxu1 %vm534_vm2, %v1041_v16 }
 0x3ae   : > { %2085 = vmatpush3.bf16.msra.mxu1 %v1152_v18  ;;  %2086 = vmatprep.mubr.msk.bf16.mxu1 %vm2325_vm0, %v2324_v1 }
 0x3af   : > { %2096 = vmatprep.subr.bf16.mxu1 %v2324_v1 }
 0x3b6   : > { %1338 = vrot.lane.b32.xlu0 %v2502_v26, %s2330_s16  ;;  %s2266_s16 = scalar_lea.vmem %s2265_s2, 512 }
 0x3e8   : > { %v982_v19 = vpop.xlane.xlu0 %981 }
 0x3e9   : > { %2238 = vrcp.f32 %v982_v19 }
 0x3ec   : > { %v985_v22 = vpop.xlane.xlu1 %984 }
 0x3ed   : > { %2240 = vrcp.f32 %v985_v22 }
 0x3f0   : > { %v988_v24 = vpop.xlane.xlu0 %987 }
 0x3f1   : > { %2242 = vrcp.f32 %v988_v24 }
 0x3f3   : > { %v2239_v25 = vpop.eup %2238 }
 0x3f4   : > { %v1010_v28 = vmul.f32 %v2239_v25, %v982_v19  ;;  %v991_v27 = vpop.xlane.xlu1 %990 }
 0x3f5   : > { %2244 = vrcp.f32 %v991_v27 }
 0x3f6   : > { %v1018_v29 = vsub.f32 2.0, %v1010_v28 }
 0x3f7   : > { %v2241_v30 = vpop.eup %2240 }
 0x3f8   : > { %v1026_v31 = vmul.f32 %v2239_v25, %v1018_v29  ;;  %v1011_v32 = vmul.f32 %v2241_v30, %v985_v22  ;;  %v994_v33 = vpop.xlane.xlu0 %993  ;;  %v1291_v48 = vpop.permute.xlu1 %1290 }
 0x3f9   : > { %2246 = vrcp.f32 %v994_v33 }
 0x3fa   : > { %v1034_v34 = vmul.f32 %v2576_v44, %v1026_v31  ;;  %v1019_v35 = vsub.f32 2.0, %v1011_v32 }
 0x3fb   : > { %v2243_v26 = vpop.eup %2242 }
 0x3fc   : > { %v1042_v36 = vpack.c.bf16 %v1034_v34, %v1034_v34  ;;  %v1027_v37 = vmul.f32 %v2241_v30, %v1019_v35  ;;  %v1012_v38 = vmul.f32 %v2243_v26, %v988_v24  ;;  %v1243_v17 = vpop.permute.xlu0 %1242 }
 0x3fd   : > { %v1248_v46 = vsel %vm1054_vm3, %v1243_v17, 0 }
 0x3fe   : > { %v1035_v39 = vmul.f32 %v2580_v49, %v1027_v37  ;;  %v1020_v20 = vsub.f32 2.0, %v1012_v38  ;;  %2081 = vmatmul.mubr.msk.bf16.vlgmr.msra.gmra.mrb[24].mxu0 %vm534_vm2, %v1042_v36 }
 0x3ff   : > { %v2245_v40 = vpop.eup %2244  ;;  %2091 = vmatpush3.bf16.msra.mxu0 %v1200_v21  ;;  %2092 = vmatprep.mubr.msk.bf16.mxu0 %vm2325_vm0, %v2324_v1 }
 0x400   : > { %v1043_v41 = vpack.c.bf16 %v1035_v39, %v1035_v39  ;;  %v1028_v42 = vmul.f32 %v2243_v26, %v1020_v20  ;;  %v1013_v43 = vmul.f32 %v2245_v40, %v991_v27  ;;  %2102 = vmatprep.subr.bf16.mxu0 %v2324_v1 }
 0x402   : > { %v1036_v44 = vmul.f32 %v2584_v52, %v1028_v42  ;;  %v1021_v45 = vsub.f32 2.0, %v1013_v43  ;;  %2087 = vmatmul.mubr.msk.bf16.vlgmr.msra.gmra.mrb[16].mxu1 %vm534_vm2, %v1043_v41  ;;  %v1296_v52 = vsel %vm1054_vm3, %v1291_v48, 0 }
 0x403   : > { %v2247_v47 = vpop.eup %2246  ;;  %2097 = vmatpush3.bf16.msra.mxu1 %v1248_v46  ;;  %2098 = vmatprep.mubr.msk.bf16.mxu1 %vm2325_vm0, %v2324_v1 }
 0x404   : > { %v1044_v49 = vpack.c.bf16 %v1036_v44, %v1036_v44  ;;  %v1029_v50 = vmul.f32 %v2245_v40, %v1021_v45  ;;  %v1014_v51 = vmul.f32 %v2247_v47, %v994_v33  ;;  %2108 = vmatprep.subr.bf16.mxu1 %v2324_v1  ;;  %v2208_v44 = vld [vmem:[%s2826_s3] sm:$0xff]   ;;  %v2209_v45 = vld [vmem:[%s2826_s3 + $0x8] sm:$0xff]   ;;  %s2754_s3 = scalar_lea.hbm %s2815_s13, %s1965_s24 }
 0x406   : > { %v1037_v53 = vmul.f32 %v2588_v55, %v1029_v50  ;;  %v1022_v54 = vsub.f32 2.0, %v1014_v51  ;;  %2093 = vmatmul.mubr.msk.bf16.vlgmr.msra.gmra.mrb[28].mxu0 %vm534_vm2, %v1044_v49 }
 0x407   : > { %2103 = vmatpush3.bf16.msra.mxu0 %v1296_v52  ;;  %2104 = vmatprep.mubr.msk.bf16.mxu0 %vm2325_vm0, %v2324_v1 }
 0x408   : > { %v1045_v56 = vpack.c.bf16 %v1037_v53, %v1037_v53  ;;  %v1030_v57 = vmul.f32 %v2247_v47, %v1022_v54  ;;  %2114 = vmatprep.subr.bf16.mxu0 %v2324_v1 }
 0x40a   : > { %v1038_v58 = vmul.f32 %v2593_v59, %v1030_v57  ;;  %2099 = vmatmul.mubr.msk.bf16.vlgmr.msra.gmra.mrb[20].mxu1 %vm534_vm2, %v1045_v56 }
 0x40b   : > { %2110 = vmatprep.mubr.msk.bf16.mxu1 %vm2325_vm0, %v2324_v1 }
 0x40c   : > { %v1046_v55 = vpack.c.bf16 %v1038_v58, %v1038_v58 }
 0x40e   : > { %2105 = vmatmul.mubr.msk.bf16.vlgmr.msra.gmra.mrb[32].mxu0 %vm534_vm2, %v1046_v55 }
 0x40f   : > { %2116 = vmatprep.mubr.msk.bf16.mxu0 %vm2325_vm0, %v2324_v1 }
 0x429   : > { %v997_v60 = vpop.xlane.xlu1 %996 }
 0x42a   : > { %2248 = vrcp.f32 %v997_v60 }
 0x42d   : > { %v1387_v61 = vpop.permute.xlu1 %1386  ;;  %v1000_v62 = vpop.xlane.xlu0 %999 }
 0x42e   : > { %v1392_v63 = vsel %vm1054_vm3, %v1387_v61, 0  ;;  %2250 = vrcp.f32 %v1000_v62 }
 0x42f   : > { %2115 = vmatpush3.bf16.msra.mxu0 %v1392_v63 }
 0x430   : > { %2128 = vmatprep.subr.bf16.mxu0 %v2324_v1 }
 0x431   : > { %v1339_v59 = vpop.permute.xlu0 %1338 }
 0x432   : > { %v1344_v0 = vsel %vm1054_vm3, %v1339_v59, 0 }
 0x433   : > { %2109 = vmatpush3.bf16.msra.mxu1 %v1344_v0 }
 0x434   : > { %v2249_v2 = vpop.eup %2248  ;;  %2120 = vmatprep.subr.bf16.mxu1 %v2324_v1 }
 0x435   : > { %v1015_v5 = vmul.f32 %v2249_v2, %v997_v60 }
 0x437   : > { %v1023_v6 = vsub.f32 2.0, %v1015_v5 }
 0x438   : > { %v2251_v7 = vpop.eup %2250 }
 0x439   : > { %v1031_v23 = vmul.f32 %v2249_v2, %v1023_v6  ;;  %v1016_v14 = vmul.f32 %v2251_v7, %v1000_v62 }
 0x43b   : > { %v1039_v10 = vmul.f32 %v2604_v8, %v1031_v23  ;;  %v1024_v11 = vsub.f32 2.0, %v1016_v14 }
 0x43d   : > { %v1047_v12 = vpack.c.bf16 %v1039_v10, %v1039_v10  ;;  %v1032_v13 = vmul.f32 %v2251_v7, %v1024_v11  ;;  %v1936_v10 = vld [vmem:[%s2806_s4] ss:$0 sm:$0xff] }
 0x43f   : > { %v1040_v15 = vmul.f32 %v2608_v9, %v1032_v13  ;;  %2111 = vmatmul.mubr.msk.bf16.vlgmr.msra.gmra.mrb[24].mxu1 %vm534_vm2, %v1047_v12 }
 0x440   : > { %2124 = vmatprep.mubr.msk.bf16.mxu1 %vm2325_vm0, %v2324_v1  ;;  %2121 = vmatpush3.bf16.msra.mxu1 %v2208_v44 }
 0x441   : > { %v1048_v16 = vpack.c.bf16 %v1040_v15, %v1040_v15  ;;  %2122 = vmatprep.subr.bf16.mxu1 %v2324_v1 }
 0x443   : > { %2117 = vmatmul.mubr.msk.bf16.vlgmr.msra.gmra.mrb[36].mxu0 %vm534_vm2, %v1048_v16 }
 0x444   : > { %2132 = vmatprep.mubr.msk.bf16.mxu0 %vm2325_vm0, %v2324_v1  ;;  %2123 = vmatpush3.bf16.msra.mxu1 %v2209_v45  ;;  %v1941_v45 = vld [vmem:[%s2807_s5] ss:$0 sm:$0xff] }
 0x445   : > { %2136 = vmatprep.subr.bf16.mxu1 %v2324_v1 }
 0x480   : > { %v2660_v18 = vpop.f32.mrb[12].mxu1 }
 0x481   : > { %v2076_v19 = vpop.f32.mrb[13].mxu1  ;;  %v1434_v61 = vpack.c.bf16 %v2660_v18, %v2660_v18 }
 0x482   : > { %v1095_v8 = vpop.f32.mrb[14].mxu1 }
 0x483   : > { %v2077_v22 = vpop.f32.mrb[15].mxu1 }
 0x4d1   : > { %v1140_v24 = vpop.f32.mrb[24].mxu0 }
 0x4d2   : > { %v1435_v25 = vpack.c.bf16 %v1140_v24, %v1140_v24  ;;  %v2082_v28 = vpop.f32.mrb[25].mxu0 }
 0x4d3   : > { %v1143_v9 = vpop.f32.mrb[26].mxu0 }
 0x4d4   : > { %1444 = vrot.lane.b32.xlu0 %v1435_v25, %s2816_s20  ;;  %v2083_v27 = vpop.f32.mrb[27].mxu0 }
 0x4d5   : > { %v1188_v29 = vpop.f32.mrb[16].mxu1 }
 0x4d6   : > { %v1436_v30 = vpack.c.bf16 %v1188_v29, %v1188_v29  ;;  %v2088_v31 = vpop.f32.mrb[17].mxu1 }
 0x4d7   : > { %v1191_v32 = vpop.f32.mrb[18].mxu1 }
 0x4d8   : > { %v2089_v33 = vpop.f32.mrb[19].mxu1  ;;  %1450 = vrot.lane.b32.xlu0 %v1436_v30, %s2332_s21 }
 0x4d9   : > { %v1236_v34 = vpop.f32.mrb[28].mxu0 }
 0x4da   : > { %v1437_v35 = vpack.c.bf16 %v1236_v34, %v1236_v34  ;;  %v2094_v26 = vpop.f32.mrb[29].mxu0  ;;  %v2211_v34 = vld [vmem:[%s2809_s7 + $0x8] sm:$0xff]  }
 0x4db   : > { %v1239_v36 = vpop.f32.mrb[30].mxu0  ;;  %v2213_v26 = vld [vmem:[%s2811_s9 + $0x8] sm:$0xff]  }
 0x4dc   : > { %1456 = vrot.lane.b32.xlu0 %v1437_v35, %s2333_s22  ;;  %v2095_v37 = vpop.f32.mrb[31].mxu0  ;;  %v2212_v35 = vld [vmem:[%s2811_s9] sm:$0xff]   ;;  %v2214_v36 = vld [vmem:[%s2811_s9 + $0x10] sm:$0xff]  }
 0x4dd   : > { %v1284_v38 = vpop.f32.mrb[20].mxu1  ;;  %v2215_v37 = vld [vmem:[%s2811_s9 + $0x18] sm:$0xff]  }
 0x4de   : > { %v2100_v21 = vpop.f32.mrb[21].mxu1  ;;  %v1438_v62 = vpack.c.bf16 %v1284_v38, %v1284_v38  ;;  %v2216_v38 = vld [vmem:[%s2811_s9 + $0x20] sm:$0xff]  }
 0x4df   : > { %v1287_v39 = vpop.f32.mrb[22].mxu1  ;;  %v2217_v21 = vld [vmem:[%s2811_s9 + $0x28] sm:$0xff]  }
 0x4e0   : > { %v2101_v20 = vpop.f32.mrb[23].mxu1 }
 0x4e1   : > { %v1332_v40 = vpop.f32.mrb[32].mxu0 }
 0x4e2   : > { %v1439_v17 = vpack.c.bf16 %v1332_v40, %v1332_v40  ;;  %v2106_v41 = vpop.f32.mrb[33].mxu0 }
 0x4e3   : > { %v1335_v42 = vpop.f32.mrb[34].mxu0 }
 0x4e4   : > { %1446 = vrot.lane.b32.xlu1 %v1439_v17, %s2816_s20  ;;  %v2107_v43 = vpop.f32.mrb[35].mxu0  ;;  %s1905_s20 = sshll.u32 %s432_s15, 4 }
 0x4e5   : > { %s434_s30 = scalar_lea.vmem [#allocation2], %s1905_s20 }
 0x4e6   : > { %s1839_s0 = sshll.u32 %s434_s30, 4  ;;  %s2757_s0 = int_to_ptr.vmem [resolvable:$true] %s1839_s0 }
 0x4e7   : > { %s2260_s20 = scalar_lea.vmem %s2757_s0, 256  ;;  %p2267_p0 = scmp.lt.s32.totalorder %s2757_s0, %s2265_s2 }
 0x4e8   : > { %p2261_p11 = scmp.ne.s32.totalorder %s2757_s0, %s2260_s20  ;;  %p2268_p1 = scmp.lt.s32.totalorder %s2266_s16, %s2260_s20 }
 0x4ea   : > { %p2262_p12 = pnand %p2261_p11, %p2444_p5  ;;  %p2269_p2 = por %p2268_p1, %p2267_p0 }
 0x4ec   : > { %p2263_p13 = pneg %p2262_p12 }
 0x4ee   : > { %p2270_p3 = pnand %p2269_p2, %p2263_p13 }
 0x512   : > { %v1380_v46 = vpop.f32.mrb[24].mxu1 }
 0x513   : > { %v1440_v47 = vpack.c.bf16 %v1380_v46, %v1380_v46  ;;  %v2112_v48 = vpop.f32.mrb[25].mxu1 }
 0x514   : > { %v1383_v49 = vpop.f32.mrb[26].mxu1 }
 0x515   : > { %v2113_v50 = vpop.f32.mrb[27].mxu1  ;;  %1452 = vrot.lane.b32.xlu1 %v1440_v47, %s2332_s21  ;;  %v1942_v49 = vld [vmem:[%s2808_s6] ss:$0 sm:$0xff] }
 0x516   : > { %v1428_v51 = vpop.f32.mrb[36].mxu0 }
 0x517   : > { %v1441_v53 = vpack.c.bf16 %v1428_v51, %v1428_v51  ;;  %v2118_v52 = vpop.f32.mrb[37].mxu0 }
 0x518   : > { %v1431_v54 = vpop.f32.mrb[38].mxu0 }
 0x519   : > { %1458 = vrot.lane.b32.xlu1 %v1441_v53, %s2333_s22  ;;  %v2119_v56 = vpop.f32.mrb[39].mxu0  ;;  %v2218_v54 = vld [vmem:[%s2811_s9 + $0x30] sm:$0xff]  }
 0x51a   : > { %v2219_v56 = vld [vmem:[%s2811_s9 + $0x38] sm:$0xff]  }
 0x546   : > { %v1445_v57 = vpop.permute.xlu0 %1444 }
 0x547   : > { %v1462_v59 = vsel %vm534_vm2, %v1434_v61, %v1445_v57  ;;  %v1943_v57 = vld [vmem:[%s2810_s8] ss:$0 sm:$0xff] }
 0x54a   : > { %v1451_v58 = vpop.permute.xlu0 %1450 }
 0x54b   : > { %v1468_v2 = vsel %vm1466_vm4, %v1462_v59, %v1451_v58 }
 0x54e   : > { %v1457_v63 = vpop.permute.xlu0 %1456 }
 0x54f   : > { %v1473_v7 = vsel %vm1471_vm5, %v1468_v2, %v1457_v63 }
 0x556   : > { %v1447_v55 = vpop.permute.xlu1 %1446 }
 0x557   : > { %v1465_v0 = vsel %vm534_vm2, %v1438_v62, %v1447_v55 }
 0x587   : > { %v1453_v60 = vpop.permute.xlu1 %1452 }
 0x588   : > { %v1470_v5 = vsel %vm1466_vm4, %v1465_v0, %v1453_v60 }
 0x58b   : > { %v1459_v6 = vpop.permute.xlu1 %1458 }
 0x58c   : > { %v1475_v23 = vsel %vm1471_vm5, %v1470_v5, %v1459_v6 }
 0x58d   : > { %v1937_v14 = vcombine.low %v1473_v7, %v1475_v23 }
 0x58f   : > { %2125 = vmatmul.mubr.msk.bf16.vlgmr.msra.gmra.mrb[28].mxu1 %vm469_vm1, %v1937_v14 }
 0x590   : > { %2152 = vmatprep.mubr.msk.bf16.mxu1 %vm2325_vm0, %v2324_v1  ;;  %2137 = vmatpush3.bf16.msra.mxu1 %v2212_v35 }
 0x591   : > { %2138 = vmatprep.subr.bf16.mxu1 %v2324_v1 }
 0x594   : > { %2139 = vmatpush3.bf16.msra.mxu1 %v2213_v26 }
 0x595   : > { %2140 = vmatprep.subr.bf16.mxu1 %v2324_v1 }
 0x598   : > { %2141 = vmatpush3.bf16.msra.mxu1 %v2214_v36  ;;  %v1957_v36 = vld [vmem:[%s2814_s12] ss:$0 sm:$0xff] }
 0x599   : > { %2142 = vmatprep.subr.bf16.mxu1 %v2324_v1 }
 0x59c   : > { %2143 = vmatpush3.bf16.msra.mxu1 %v2215_v37 }
 0x59d   : > { %2144 = vmatprep.subr.bf16.mxu1 %v2324_v1 }
 0x5a0   : > { %2145 = vmatpush3.bf16.msra.mxu1 %v2216_v38 }
 0x5a1   : > { %2146 = vmatprep.subr.bf16.mxu1 %v2324_v1 }
 0x5a4   : > { %2147 = vmatpush3.bf16.msra.mxu1 %v2217_v21 }
 0x5a5   : > { %2148 = vmatprep.subr.bf16.mxu1 %v2324_v1 }
 0x5a8   : > { %2149 = vmatpush3.bf16.msra.mxu1 %v2218_v54 }
 0x5a9   : > { %2150 = vmatprep.subr.bf16.mxu1 %v2324_v1 }
 0x5ac   : > { %2151 = vmatpush3.bf16.msra.mxu1 %v2219_v56 }
 0x662   : > { %v1541_v11 = vpop.f32.mrb[28].mxu1 }
 0x663   : > { %v1542_v12 = vadd.f32 %v1936_v10, %v1541_v11  ;;  %v2126_v13 = vpop.f32.mrb[29].mxu1 }
 0x664   : > { %v1544_v15 = vpop.f32.mrb[30].mxu1 }
 0x665   : > { %v1545_v16 = vadd.f32 %v1936_v10, %v1544_v15  ;;  %v2127_v18 = vpop.f32.mrb[31].mxu1  ;;  %v1548_v19 = vadd.f32 %v1542_v12, %v2472_v3 }
 0x667   : > { %v1552_v8 = vsel %vm469_vm1, %v1548_v19, 0.0  ;;  %v1549_v22 = vadd.f32 %v1545_v16, %v2474_v4  ;;  %v2210_v4 = vld [vmem:[%s2809_s7] sm:$0xff]  }
 0x668   : > { %1553 = vadd.xlane.f32.xlu0 %v1552_v8  ;;  %2129 = vmatpush3.bf16.msra.mxu0 %v2210_v4 }
 0x669   : > { %v1555_v24 = vsel %vm469_vm1, %v1549_v22, 0.0  ;;  %2130 = vmatprep.subr.bf16.mxu0 %v2324_v1  ;;  %v1947_v1 = vld [vmem:[%s2812_s10] ss:$0 sm:$0xff] }
 0x66a   : > { %1556 = vadd.xlane.f32.xlu1 %v1555_v24 }
 0x66c   : > { %2131 = vmatpush3.bf16.msra.mxu0 %v2211_v34  ;;  %v1956_v34 = vld [vmem:[%s2813_s11] ss:$0 sm:$0xff] }
 0x6f5   : > { %v1554_v25 = vpop.xlane.xlu0 %1553 }
 0x6f6   : > { %v1558_v28 = vmul.f32 0.03125, %v1554_v25 }
 0x6f7   : > { %v1557_v9 = vpop.xlane.xlu1 %1556 }
 0x6f8   : > { %v1560_v27 = vsub.f32 %v1548_v19, %v1558_v28  ;;  %v1559_v29 = vmul.f32 0.03125, %v1557_v9 }
 0x6fa   : > { %v1561_v30 = vsub.f32 %v1549_v22, %v1559_v29  ;;  %v1562_v31 = vmul.f32 %v1560_v27, %v1560_v27 }
 0x6fc   : > { %v1564_v32 = vsel %vm469_vm1, %v1562_v31, 0.0  ;;  %v1563_v33 = vmul.f32 %v1561_v30, %v1561_v30 }
 0x6fd   : > { %1565 = vadd.xlane.f32.xlu0 %v1564_v32 }
 0x6fe   : > { %v1567_v3 = vsel %vm469_vm1, %v1563_v33, 0.0 }
 0x701   : > { %1568 = vadd.xlane.f32.xlu0 %v1567_v3 }
 0x78a   : > { %v1566_v39 = vpop.xlane.xlu0 %1565 }
 0x78b   : > { %v1570_v20 = vmul.f32 0.03125, %v1566_v39 }
 0x78d   : > { %v1572_v40 = vadd.f32 1e-05, %v1570_v20 }
 0x78e   : > { %v1569_v17 = vpop.xlane.xlu0 %1568 }
 0x78f   : > { %2252 = vrsqrt.f32 %v1572_v40  ;;  %v1571_v41 = vmul.f32 0.03125, %v1569_v17 }
 0x791   : > { %v1573_v42 = vadd.f32 1e-05, %v1571_v41 }
 0x793   : > { %2254 = vrsqrt.f32 %v1573_v42 }
 0x799   : > { %v2253_v43 = vpop.eup %2252 }
 0x79a   : > { %v1576_v44 = vmul.f32 %v2253_v43, %v1560_v27 }
 0x79c   : > { %v1584_v47 = vmul.f32 %v1941_v45, %v1576_v44 }
 0x79d   : > { %v2255_v46 = vpop.eup %2254 }
 0x79e   : > { %v1577_v48 = vmul.f32 %v2255_v46, %v1561_v30  ;;  %v1592_v51 = vadd.f32 %v1942_v49, %v1584_v47 }
 0x7a0   : > { %v1585_v50 = vmul.f32 %v1941_v45, %v1577_v48 }
 0x7a2   : > { %v1593_v53 = vadd.f32 %v1942_v49, %v1585_v50 }
 0x7a4   : > { %v1594_v52 = vpack.c.bf16 %v1593_v53, %v1592_v51 }
 0x7a6   : > { %2133 = vmatmul.mubr.msk.bf16.vlgmr.msra.gmra.mrb[40].mxu0 %vm469_vm1, %v1594_v52 }
 0x879   : > { %v1655_v58 = vpop.f32.mrb[40].mxu0 }
 0x87a   : > { %v1656_v55 = vadd.f32 %v1943_v57, %v1655_v58  ;;  %v2134_v60 = vpop.f32.mrb[41].mxu0 }
 0x87b   : > { %v1658_v61 = vpop.f32.mrb[42].mxu0 }
 0x87c   : > { %v1659_v62 = vadd.f32 %v1943_v57, %v1658_v61  ;;  %v2135_v63 = vpop.f32.mrb[43].mxu0  ;;  %v1662_v59 = vmax.f32 %v1656_v55, 0.0 }
 0x87e   : > { %v1663_v0 = vmax.f32 %v1659_v62, 0.0 }
 0x880   : > { %v1664_v2 = vpack.c.bf16 %v1663_v0, %v1662_v59 }
 0x882   : > { %2153 = vmatmul.mubr.bf16.vlgmr.msra.gmra.mrb[32].mxu1 %v1664_v2 }
 0x955   : > { %v1770_v5 = vpop.f32.mrb[32].mxu1 }
 0x956   : > { %v1771_v6 = vadd.f32 %v1947_v1, %v1770_v5  ;;  %v2154_v7 = vpop.f32.mrb[33].mxu1 }
 0x957   : > { %v1773_v23 = vpop.f32.mrb[34].mxu1 }
 0x958   : > { %v1774_v14 = vadd.f32 %v1947_v1, %v1773_v23  ;;  %v2155_v10 = vpop.f32.mrb[35].mxu1  ;;  %v1777_v11 = vadd.f32 %v1771_v6, %v1592_v51 }
 0x95a   : > { %v1781_v12 = vsel %vm469_vm1, %v1777_v11, 0.0  ;;  %v1778_v13 = vadd.f32 %v1774_v14, %v1593_v53 }
 0x95b   : > { %1782 = vadd.xlane.f32.xlu1 %v1781_v12 }
 0x95c   : > { %v1784_v15 = vsel %vm469_vm1, %v1778_v13, 0.0 }
 0x95d   : > { %1785 = vadd.xlane.f32.xlu0 %v1784_v15 }
 0x9e8   : > { %v1783_v16 = vpop.xlane.xlu1 %1782 }
 0x9e9   : > { %v1787_v18 = vmul.f32 0.03125, %v1783_v16 }
 0x9ea   : > { %v1786_v19 = vpop.xlane.xlu0 %1785 }
 0x9eb   : > { %v1789_v8 = vsub.f32 %v1777_v11, %v1787_v18  ;;  %v1788_v22 = vmul.f32 0.03125, %v1786_v19 }
 0x9ed   : > { %v1790_v24 = vsub.f32 %v1778_v13, %v1788_v22  ;;  %v1791_v25 = vmul.f32 %v1789_v8, %v1789_v8 }
 0x9ef   : > { %v1793_v28 = vsel %vm469_vm1, %v1791_v25, 0.0  ;;  %v1792_v9 = vmul.f32 %v1790_v24, %v1790_v24 }
 0x9f0   : > { %1794 = vadd.xlane.f32.xlu1 %v1793_v28 }
 0x9f1   : > { %v1796_v27 = vsel %vm469_vm1, %v1792_v9, 0.0 }
 0x9f2   : > { %1797 = vadd.xlane.f32.xlu0 %v1796_v27 }
 0xa7d   : > { %v1795_v29 = vpop.xlane.xlu1 %1794 }
 0xa7e   : > { %v1799_v30 = vmul.f32 0.03125, %v1795_v29 }
 0xa7f   : > { %v1798_v31 = vpop.xlane.xlu0 %1797 }
 0xa80   : > { %v1801_v32 = vadd.f32 1e-05, %v1799_v30  ;;  %v1800_v33 = vmul.f32 0.03125, %v1798_v31 }
 0xa82   : > { %2256 = vrsqrt.f32 %v1801_v32  ;;  %v1802_v3 = vadd.f32 1e-05, %v1800_v33 }
 0xa84   : > { %2258 = vrsqrt.f32 %v1802_v3 }
 0xa8c   : > { %v2257_v4 = vpop.eup %2256 }
 0xa8d   : > { %v1805_v35 = vmul.f32 %v2257_v4, %v1789_v8 }
 0xa8e   : > { %v2259_v26 = vpop.eup %2258 }
 0xa8f   : > { %v1813_v37 = vmul.f32 %v1956_v34, %v1805_v35  ;;  %v1806_v38 = vmul.f32 %v2259_v26, %v1790_v24 }
 0xa91   : > { %v1821_v21 = vadd.f32 %v1957_v36, %v1813_v37  ;;  %v1814_v39 = vmul.f32 %v1956_v34, %v1806_v38 }
 0xa93   : > { %v1822_v20 = vadd.f32 %v1957_v36, %v1814_v39  ;;  %1823 = vst.msk [vmem:[%s434_s30] sm:$0xff] %vm469_vm1, %v1821_v21 }
 0xa95   : > { %1824 = vst.msk [vmem:[%s434_s30 + $0x8] sm:$0xff] %vm469_vm1, %v1822_v20 }
 0xa96   : > { %2273 = shalt.err (!%p2270_p3)
}
 0xa97   : > { %s2274_s15 = scalar_lea.hbm %s2754_s3, 256  ;;  %s2278_s23 = scalar_lea.hbm %s2815_s13, 512 }
 0xa98   : > { %p2275_p4 = scmp.ne.s32.totalorder %s2754_s3, %s2274_s15  ;;  %p2279_p9 = scmp.lt.u32.totalorder %s2754_s3, %s2815_s13 }
 0xa99   : > { %p2280_p10 = scmp.lt.u32.totalorder %s2278_s23, %s2274_s15  ;;  %p2282_p12 = scmp.lt.u32.totalorder %s2274_s15, %s2754_s3 }
 0xa9a   : > { %p2276_p7 = pnand %p2275_p4, %p2444_p5 }
 0xa9b   : > { %p2281_p11 = por %p2280_p10, %p2279_p9 }
 0xa9c   : > { %p2277_p8 = pneg %p2276_p7 }
 0xa9d   : > { %p2283_p13 = por %p2282_p12, %p2281_p11 }
 0xa9f   : > { %p2284_p0 = pnand %p2283_p13, %p2277_p8 }
 0xaa1   : > { %2287 = shalt.err (!%p2284_p0)
}
 0xaa2   : > { %s2335_s20 = smov 128   ;;  %s2827_s1 = smov 8  }
 0xaa3   : > { %2156 = dma.vmem_to_hbm [thread:$0]  (%p2444_p5), %s2757_s0, 256, %s2754_s3, %s2760_s29, %s2335_s20, %s2335_s20, %s2827_s1  }
 0xaa4 PF: > { %p2162_p1 = scmp.ge.s32.totalorder %s2322_s28, 2  ;;  %s1854_s2 = sand.u32 1, %s2310_s25  }
 0xaa5   : > { %s1855_s16 = scalar_lea.sflag [#allocation3], %s1854_s2 }
 0xaa6   : > { %p2159_p2 = pnand %p2162_p1, %p2448_p6 }
 0xaa8   : > { %2305 = dma.done.wait (!%p2159_p2), %s1855_s16, 256  }
 0xaa9   : > { %2307 = vsyncadd (!%p2159_p2), %s1855_s16, 4294967040  ;;  %p23_p3 = scmp.ge.s32.totalorder %s2431_s14, 4   ;;  %s2828_s25 = smov %s2314_s26 }
 0xaaa   : > { %s2829_s26 = smov %s2318_s27  ;;  %s2830_s27 = smov %s2442_s17 }
 0xaab   : > { %s2831_s28 = smov %s2431_s14  ;;  %25 = sbr.rel (!%p23_p3) target bundleno = 8 (0x8), region = 107 }
 0xab2   :  { %1860 = vsyncpa [#allocation3], 1 }
 0xab3   :  { %1862 = vsyncpa [#allocation3 + $0x1], 1 }

</bundles_post_ra>
